<compile_context>
chip_gen: v5e
topology: v5e:2x2
jax: 0.10.0
libtpu: 0.0.40
codegen_flags: <defaults>
</compile_context>

<pallas_src>
import jax
import jax.numpy as jnp
import numpy as np
from jax import lax
from jax.experimental import pallas as pl
from jax.experimental.pallas import tpu as pltpu


# ---------------------------------------------------------------------------
# Fused whole-network Pallas kernel (one grid step = one image)
# ---------------------------------------------------------------------------

def _fused_net_kernel(x_ref,                       # (1, 32, 96)  image, (H, W*C)
                      w1_ref, b1_ref,              # (5, 96, 168), (1, 168)
                      re1_ref, ro1_ref,            # (14, 28) row selectors
                      ce1_ref, co1_ref,            # (168, 84) col selectors
                      w2_ref, b2_ref,              # (5, 84, 160), (1, 160)
                      re2_ref, ro2_ref,            # (5, 10)
                      ce2_ref, co2_ref,            # (160, 80)
                      wf1_ref, bf1_ref,            # (5, 80, 120), (1, 120)
                      wf2_ref, bf2_ref,            # (120, 84), (1, 84)
                      wf3_ref, bf3_ref,            # (84, 128), (1, 128) padded
                      o_ref):                      # (1, 1, 128)
    f32 = jnp.float32

    # ---- conv1 (VALID 5x5, 3->6) as 5 Toeplitz matmuls; out (28, 28*6) -----
    acc = jnp.dot(x_ref[0, 0:28, :], w1_ref[0], preferred_element_type=f32)
    for di in range(1, 5):
        acc = acc + jnp.dot(x_ref[0, di:di + 28, :], w1_ref[di],
                            preferred_element_type=f32)
    y1 = jnp.maximum(acc + b1_ref[...], 0.0)                      # (28, 168)

    # ---- maxpool 2x2 (rows via selector matmul, cols via selector matmul) --
    yr1 = jnp.maximum(jnp.dot(re1_ref[...], y1, preferred_element_type=f32),
                      jnp.dot(ro1_ref[...], y1, preferred_element_type=f32))
    p1 = jnp.maximum(jnp.dot(yr1, ce1_ref[...], preferred_element_type=f32),
                     jnp.dot(yr1, co1_ref[...], preferred_element_type=f32))
    # p1: (14, 14*6) -- already the (H, W*C) layout conv2 expects.

    # ---- conv2 (VALID 5x5, 6->16); out (10, 10*16) -------------------------
    acc2 = jnp.dot(p1[0:10, :], w2_ref[0], preferred_element_type=f32)
    for di in range(1, 5):
        acc2 = acc2 + jnp.dot(p1[di:di + 10, :], w2_ref[di],
                              preferred_element_type=f32)
    y2 = jnp.maximum(acc2 + b2_ref[...], 0.0)                     # (10, 160)

    # ---- maxpool 2x2 -------------------------------------------------------
    yr2 = jnp.maximum(jnp.dot(re2_ref[...], y2, preferred_element_type=f32),
                      jnp.dot(ro2_ref[...], y2, preferred_element_type=f32))
    p2 = jnp.maximum(jnp.dot(yr2, ce2_ref[...], preferred_element_type=f32),
                     jnp.dot(yr2, co2_ref[...], preferred_element_type=f32))
    # p2: (5, 5*16) with element (h, w*16 + c).

    # ---- fc1: PyTorch NCHW-flatten folded into reordered weight slabs ------
    h1 = jnp.dot(p2[0:1, :], wf1_ref[0], preferred_element_type=f32)
    for h in range(1, 5):
        h1 = h1 + jnp.dot(p2[h:h + 1, :], wf1_ref[h],
                          preferred_element_type=f32)
    h1 = jnp.maximum(h1 + bf1_ref[...], 0.0)                      # (1, 120)

    # ---- fc2 + relu, fc3 (lane-padded to 128) ------------------------------
    h2 = jnp.maximum(jnp.dot(h1, wf2_ref[...], preferred_element_type=f32)
                     + bf2_ref[...], 0.0)                         # (1, 84)
    logits = jnp.dot(h2, wf3_ref[...], preferred_element_type=f32) \
        + bf3_ref[...]                                            # (1, 128)

    o_ref[0] = logits


def _const_spec(shape):
    zeros = (0,) * len(shape)
    return pl.BlockSpec(shape, lambda b, _z=zeros: _z)


def net_forward(x_nchw, prepped):
    """x_nchw: (N, 3, 32, 32) float32 -> logits (N, 10)."""
    N = x_nchw.shape[0]
    # Layout glue only: NCHW -> (N, H, W*C) with col = w*3 + c.
    x2 = jnp.transpose(x_nchw, (0, 2, 3, 1)).reshape(N, 32, 32 * 3)

    p = prepped
    out = pl.pallas_call(
        _fused_net_kernel,
        out_shape=jax.ShapeDtypeStruct((N, 1, 128), jnp.float32),
        grid=(N,),
        in_specs=[
            pl.BlockSpec((1, 32, 96), lambda b: (b, 0, 0)),   # x (per image)
            _const_spec((5, 96, 168)),                        # w1 (Toeplitz)
            _const_spec((1, 168)),                            # b1
            _const_spec((14, 28)), _const_spec((14, 28)),     # re1, ro1
            _const_spec((168, 84)), _const_spec((168, 84)),   # ce1, co1
            _const_spec((5, 84, 160)),                        # w2 (Toeplitz)
            _const_spec((1, 160)),                            # b2
            _const_spec((5, 10)), _const_spec((5, 10)),       # re2, ro2
            _const_spec((160, 80)), _const_spec((160, 80)),   # ce2, co2
            _const_spec((5, 80, 120)),                        # wf1 (reordered)
            _const_spec((1, 120)),                            # bf1
            _const_spec((120, 84)),                           # wf2
            _const_spec((1, 84)),                             # bf2
            _const_spec((84, 128)),                           # wf3 (padded)
            _const_spec((1, 128)),                            # bf3 (padded)
        ],
        out_specs=pl.BlockSpec((1, 1, 128), lambda b: (b, 0, 0)),
        compiler_params=pltpu.CompilerParams(
            dimension_semantics=("parallel",),
            vmem_limit_bytes=32 * 1024 * 1024,
        ),
    )(x2,
      p["w1"], p["b1"], p["re1"], p["ro1"], p["ce1"], p["co1"],
      p["w2"], p["b2"], p["re2"], p["ro2"], p["ce2"], p["co2"],
      p["wf1"], p["bf1"], p["wf2"], p["bf2"], p["wf3"], p["bf3"])

    return out.reshape(N, 128)[:, :10]


# ---------------------------------------------------------------------------
# One-time parameter preparation (all layout work hoisted out of the kernel)
# ---------------------------------------------------------------------------

def prepare_params(params):
    f32 = jnp.float32

    def toeplitz(cw, w_in, w_out):
        # cw: (O, C, KH, KW) PyTorch conv weight.
        # Returns T: (KH, w_in*C, w_out*O) with
        #   T[di, wj*C + c, w*O + o] = cw[o, c, di, wj - w]  (0 outside [0,KW)).
        O, C, KH, KW = cw.shape
        m = np.zeros((KW, w_in, w_out), np.float32)
        for dj in range(KW):
            for w in range(w_out):
                m[dj, w + dj, w] = 1.0
        t = jnp.einsum("ocij,jqw->iqcwo", cw.astype(f32), jnp.asarray(m))
        return t.reshape(KH, w_in * C, w_out * O)

    def row_selectors(h_out):
        re = np.zeros((h_out, 2 * h_out), np.float32)
        ro = np.zeros((h_out, 2 * h_out), np.float32)
        for i in range(h_out):
            re[i, 2 * i] = 1.0
            ro[i, 2 * i + 1] = 1.0
        return jnp.asarray(re), jnp.asarray(ro)

    def col_selectors(w_out, c):
        ce = np.zeros((2 * w_out * c, w_out * c), np.float32)
        co = np.zeros((2 * w_out * c, w_out * c), np.float32)
        for wp in range(w_out):
            for ch in range(c):
                ce[2 * wp * c + ch, wp * c + ch] = 1.0
                co[(2 * wp + 1) * c + ch, wp * c + ch] = 1.0
        return jnp.asarray(ce), jnp.asarray(co)

    w1 = toeplitz(params["conv1_w"], 32, 28)                   # (5, 96, 168)
    b1 = jnp.tile(params["conv1_b"].astype(f32), 28).reshape(1, 168)
    w2 = toeplitz(params["conv2_w"], 14, 10)                   # (5, 84, 160)
    b2 = jnp.tile(params["conv2_b"].astype(f32), 10).reshape(1, 160)

    re1, ro1 = row_selectors(14)
    ce1, co1 = col_selectors(14, 6)
    re2, ro2 = row_selectors(5)
    ce2, co2 = col_selectors(5, 16)

    # fc1: (120, 400) with flat = c*25 + h*5 + w  ->  (5, 80, 120) indexed
    # [h, w*16 + c, n], matching the kernel's pooled-activation layout.
    wf1 = params["fc1_w"].astype(f32).reshape(120, 16, 5, 5)
    wf1 = jnp.transpose(wf1, (2, 3, 1, 0)).reshape(5, 80, 120)
    bf1 = params["fc1_b"].astype(f32).reshape(1, 120)

    wf2 = params["fc2_w"].astype(f32).T                        # (120, 84)
    bf2 = params["fc2_b"].astype(f32).reshape(1, 84)

    # fc3 padded to 128 output lanes (lane-dense final store).
    wf3 = jnp.zeros((84, 128), f32).at[:, :10].set(params["fc3_w"].astype(f32).T)
    bf3 = jnp.zeros((1, 128), f32).at[:, :10].set(
        params["fc3_b"].astype(f32).reshape(1, 10))

    return dict(w1=w1, b1=b1, re1=re1, ro1=ro1, ce1=ce1, co1=co1,
                w2=w2, b2=b2, re2=re2, ro2=ro2, ce2=ce2, co2=co2,
                wf1=wf1, bf1=bf1, wf2=wf2, bf2=bf2, wf3=wf3, bf3=bf3)


# ---------------------------------------------------------------------------
# Pure-JAX reference (for correctness check) and deterministic init
# ---------------------------------------------------------------------------

def net_forward_ref(x_nchw, params):
    x = jnp.transpose(x_nchw, (0, 2, 3, 1))                    # NHWC

    def conv(x, w, b):
        y = lax.conv_general_dilated(
            x, jnp.transpose(w, (2, 3, 1, 0)), window_strides=(1, 1),
            padding="VALID", dimension_numbers=("NHWC", "HWIO", "NHWC"))
        return jnp.maximum(y + b, 0.0)

    def pool(x):
        return lax.reduce_window(x, -jnp.inf, lax.max,
                                 (1, 2, 2, 1), (1, 2, 2, 1), "VALID")

    x = pool(conv(x, params["conv1_w"], params["conv1_b"]))
    x = pool(conv(x, params["conv2_w"], params["conv2_b"]))
    N = x.shape[0]
    x = jnp.transpose(x, (0, 3, 1, 2)).reshape(N, 16 * 5 * 5)  # NCHW flatten
    x = jnp.maximum(x @ params["fc1_w"].T + params["fc1_b"], 0.0)
    x = jnp.maximum(x @ params["fc2_w"].T + params["fc2_b"], 0.0)
    return x @ params["fc3_w"].T + params["fc3_b"]


def init_params(key):
    ks = jax.random.split(key, 10)

    def u(k, shape, fan_in):
        bound = 1.0 / (fan_in ** 0.5)
        return jax.random.uniform(k, shape, jnp.float32, -bound, bound)

    return {
        "conv1_w": u(ks[0], (6, 3, 5, 5), 3 * 5 * 5),
        "conv1_b": u(ks[1], (6,), 3 * 5 * 5),
        "conv2_w": u(ks[2], (16, 6, 5, 5), 6 * 5 * 5),
        "conv2_b": u(ks[3], (16,), 6 * 5 * 5),
        "fc1_w": u(ks[4], (120, 400), 400),
        "fc1_b": u(ks[5], (120,), 400),
        "fc2_w": u(ks[6], (84, 120), 120),
        "fc2_b": u(ks[7], (84,), 120),
        "fc3_w": u(ks[8], (10, 84), 84),
        "fc3_b": u(ks[9], (10,), 84),
    }


if __name__ == "__main__":
    key = jax.random.PRNGKey(0)
    pkey, xkey = jax.random.split(key)
    params = init_params(pkey)
    prepped = prepare_params(params)          # one-time weight layout prep

    # Module implies 32x32 RGB input (16*5*5 flatten). Small batch = 2.
    x = jax.random.normal(xkey, (2, 3, 32, 32), jnp.float32)

    out = jax.jit(net_forward)(x, prepped)
    out = jax.block_until_ready(out)

    assert out.shape == (2, 10), out.shape
    assert bool(jnp.all(jnp.isfinite(out)))

    ref = jax.jit(net_forward_ref)(x, params)
    assert bool(jnp.allclose(out, ref, atol=1e-2, rtol=1e-2)), \
        "Pallas kernel mismatch vs pure-JAX reference"

    print("KERNEL_OK")
</pallas_src>

<mosaic_0001>
module attributes {stable_mosaic.version = 11 : i64} {
  func.func @_fused_net_kernel(%arg0: i32, %arg1: memref<1x32x96xf32, #tpu.memory_space<vmem>>, %arg2: memref<5x96x168xf32, #tpu.memory_space<vmem>>, %arg3: memref<1x168xf32, #tpu.memory_space<vmem>>, %arg4: memref<14x28xf32, #tpu.memory_space<vmem>>, %arg5: memref<14x28xf32, #tpu.memory_space<vmem>>, %arg6: memref<168x84xf32, #tpu.memory_space<vmem>>, %arg7: memref<168x84xf32, #tpu.memory_space<vmem>>, %arg8: memref<5x84x160xf32, #tpu.memory_space<vmem>>, %arg9: memref<1x160xf32, #tpu.memory_space<vmem>>, %arg10: memref<5x10xf32, #tpu.memory_space<vmem>>, %arg11: memref<5x10xf32, #tpu.memory_space<vmem>>, %arg12: memref<160x80xf32, #tpu.memory_space<vmem>>, %arg13: memref<160x80xf32, #tpu.memory_space<vmem>>, %arg14: memref<5x80x120xf32, #tpu.memory_space<vmem>>, %arg15: memref<1x120xf32, #tpu.memory_space<vmem>>, %arg16: memref<120x84xf32, #tpu.memory_space<vmem>>, %arg17: memref<1x84xf32, #tpu.memory_space<vmem>>, %arg18: memref<84x128xf32, #tpu.memory_space<vmem>>, %arg19: memref<1x128xf32, #tpu.memory_space<vmem>>, %arg20: memref<1x1x128xf32, #tpu.memory_space<vmem>>) attributes {dimension_semantics = [#tpu.dimension_semantics<parallel>], iteration_bounds = array<i64: 2>, scalar_prefetch = 0 : i64, scratch_operands = 0 : i64, tpu.core_type = #tpu.core_type<tc>, window_params = [{transform_indices = @transform_0, window_bounds = array<i64: 1, 32, 96>}, {pipeline_mode = #tpu.pipeline_mode<synchronous>, transform_indices = @transform_1, window_bounds = array<i64: 5, 96, 168>}, {pipeline_mode = #tpu.pipeline_mode<synchronous>, transform_indices = @transform_2, window_bounds = array<i64: 1, 168>}, {pipeline_mode = #tpu.pipeline_mode<synchronous>, transform_indices = @transform_3, window_bounds = array<i64: 14, 28>}, {pipeline_mode = #tpu.pipeline_mode<synchronous>, transform_indices = @transform_4, window_bounds = array<i64: 14, 28>}, {pipeline_mode = #tpu.pipeline_mode<synchronous>, transform_indices = @transform_5, window_bounds = array<i64: 168, 84>}, {pipeline_mode = #tpu.pipeline_mode<synchronous>, transform_indices = @transform_6, window_bounds = array<i64: 168, 84>}, {pipeline_mode = #tpu.pipeline_mode<synchronous>, transform_indices = @transform_7, window_bounds = array<i64: 5, 84, 160>}, {pipeline_mode = #tpu.pipeline_mode<synchronous>, transform_indices = @transform_8, window_bounds = array<i64: 1, 160>}, {pipeline_mode = #tpu.pipeline_mode<synchronous>, transform_indices = @transform_9, window_bounds = array<i64: 5, 10>}, {pipeline_mode = #tpu.pipeline_mode<synchronous>, transform_indices = @transform_10, window_bounds = array<i64: 5, 10>}, {pipeline_mode = #tpu.pipeline_mode<synchronous>, transform_indices = @transform_11, window_bounds = array<i64: 160, 80>}, {pipeline_mode = #tpu.pipeline_mode<synchronous>, transform_indices = @transform_12, window_bounds = array<i64: 160, 80>}, {pipeline_mode = #tpu.pipeline_mode<synchronous>, transform_indices = @transform_13, window_bounds = array<i64: 5, 80, 120>}, {pipeline_mode = #tpu.pipeline_mode<synchronous>, transform_indices = @transform_14, window_bounds = array<i64: 1, 120>}, {pipeline_mode = #tpu.pipeline_mode<synchronous>, transform_indices = @transform_15, window_bounds = array<i64: 120, 84>}, {pipeline_mode = #tpu.pipeline_mode<synchronous>, transform_indices = @transform_16, window_bounds = array<i64: 1, 84>}, {pipeline_mode = #tpu.pipeline_mode<synchronous>, transform_indices = @transform_17, window_bounds = array<i64: 84, 128>}, {pipeline_mode = #tpu.pipeline_mode<synchronous>, transform_indices = @transform_18, window_bounds = array<i64: 1, 128>}, {transform_indices = @transform_19, window_bounds = array<i64: 1, 1, 128>}]} {
    %c0 = arith.constant 0 : index
    %c0_0 = arith.constant 0 : index
    %c0_1 = arith.constant 0 : index
    %0 = vector.load %arg1[%c0, %c0_0, %c0_1] : memref<1x32x96xf32, #tpu.memory_space<vmem>>, vector<1x28x96xf32>
    %1 = vector.shape_cast %0 : vector<1x28x96xf32> to vector<28x96xf32>
    %c0_2 = arith.constant 0 : index
    %c0_3 = arith.constant 0 : index
    %c0_4 = arith.constant 0 : index
    %2 = vector.load %arg2[%c0_2, %c0_3, %c0_4] : memref<5x96x168xf32, #tpu.memory_space<vmem>>, vector<1x96x168xf32>
    %3 = vector.shape_cast %2 : vector<1x96x168xf32> to vector<96x168xf32>
    %cst = arith.constant dense<0.000000e+00> : vector<28x168xf32>
    %4 = tpu.matmul %1, %3, %cst {dimension_numbers = #tpu.dot_dimension_numbers<[1], [0], [0], [1], [0, 0, 1, 1], [], []>} : vector<28x96xf32>, vector<96x168xf32>, vector<28x168xf32> -> vector<28x168xf32>
    %c0_5 = arith.constant 0 : index
    %c1 = arith.constant 1 : index
    %c0_6 = arith.constant 0 : index
    %5 = vector.load %arg1[%c0_5, %c1, %c0_6] : memref<1x32x96xf32, #tpu.memory_space<vmem>>, vector<1x28x96xf32>
    %6 = vector.shape_cast %5 : vector<1x28x96xf32> to vector<28x96xf32>
    %c1_7 = arith.constant 1 : index
    %c0_8 = arith.constant 0 : index
    %c0_9 = arith.constant 0 : index
    %7 = vector.load %arg2[%c1_7, %c0_8, %c0_9] : memref<5x96x168xf32, #tpu.memory_space<vmem>>, vector<1x96x168xf32>
    %8 = vector.shape_cast %7 : vector<1x96x168xf32> to vector<96x168xf32>
    %cst_10 = arith.constant dense<0.000000e+00> : vector<28x168xf32>
    %9 = tpu.matmul %6, %8, %cst_10 {dimension_numbers = #tpu.dot_dimension_numbers<[1], [0], [0], [1], [0, 0, 1, 1], [], []>} : vector<28x96xf32>, vector<96x168xf32>, vector<28x168xf32> -> vector<28x168xf32>
    %10 = arith.addf %4, %9 : vector<28x168xf32>
    %c0_11 = arith.constant 0 : index
    %c2 = arith.constant 2 : index
    %c0_12 = arith.constant 0 : index
    %11 = vector.load %arg1[%c0_11, %c2, %c0_12] : memref<1x32x96xf32, #tpu.memory_space<vmem>>, vector<1x28x96xf32>
    %12 = vector.shape_cast %11 : vector<1x28x96xf32> to vector<28x96xf32>
    %c2_13 = arith.constant 2 : index
    %c0_14 = arith.constant 0 : index
    %c0_15 = arith.constant 0 : index
    %13 = vector.load %arg2[%c2_13, %c0_14, %c0_15] : memref<5x96x168xf32, #tpu.memory_space<vmem>>, vector<1x96x168xf32>
    %14 = vector.shape_cast %13 : vector<1x96x168xf32> to vector<96x168xf32>
    %cst_16 = arith.constant dense<0.000000e+00> : vector<28x168xf32>
    %15 = tpu.matmul %12, %14, %cst_16 {dimension_numbers = #tpu.dot_dimension_numbers<[1], [0], [0], [1], [0, 0, 1, 1], [], []>} : vector<28x96xf32>, vector<96x168xf32>, vector<28x168xf32> -> vector<28x168xf32>
    %16 = arith.addf %10, %15 : vector<28x168xf32>
    %c0_17 = arith.constant 0 : index
    %c3 = arith.constant 3 : index
    %c0_18 = arith.constant 0 : index
    %17 = vector.load %arg1[%c0_17, %c3, %c0_18] : memref<1x32x96xf32, #tpu.memory_space<vmem>>, vector<1x28x96xf32>
    %18 = vector.shape_cast %17 : vector<1x28x96xf32> to vector<28x96xf32>
    %c3_19 = arith.constant 3 : index
    %c0_20 = arith.constant 0 : index
    %c0_21 = arith.constant 0 : index
    %19 = vector.load %arg2[%c3_19, %c0_20, %c0_21] : memref<5x96x168xf32, #tpu.memory_space<vmem>>, vector<1x96x168xf32>
    %20 = vector.shape_cast %19 : vector<1x96x168xf32> to vector<96x168xf32>
    %cst_22 = arith.constant dense<0.000000e+00> : vector<28x168xf32>
    %21 = tpu.matmul %18, %20, %cst_22 {dimension_numbers = #tpu.dot_dimension_numbers<[1], [0], [0], [1], [0, 0, 1, 1], [], []>} : vector<28x96xf32>, vector<96x168xf32>, vector<28x168xf32> -> vector<28x168xf32>
    %22 = arith.addf %16, %21 : vector<28x168xf32>
    %c0_23 = arith.constant 0 : index
    %c4 = arith.constant 4 : index
    %c0_24 = arith.constant 0 : index
    %23 = vector.load %arg1[%c0_23, %c4, %c0_24] : memref<1x32x96xf32, #tpu.memory_space<vmem>>, vector<1x28x96xf32>
    %24 = vector.shape_cast %23 : vector<1x28x96xf32> to vector<28x96xf32>
    %c4_25 = arith.constant 4 : index
    %c0_26 = arith.constant 0 : index
    %c0_27 = arith.constant 0 : index
    %25 = vector.load %arg2[%c4_25, %c0_26, %c0_27] : memref<5x96x168xf32, #tpu.memory_space<vmem>>, vector<1x96x168xf32>
    %26 = vector.shape_cast %25 : vector<1x96x168xf32> to vector<96x168xf32>
    %cst_28 = arith.constant dense<0.000000e+00> : vector<28x168xf32>
    %27 = tpu.matmul %24, %26, %cst_28 {dimension_numbers = #tpu.dot_dimension_numbers<[1], [0], [0], [1], [0, 0, 1, 1], [], []>} : vector<28x96xf32>, vector<96x168xf32>, vector<28x168xf32> -> vector<28x168xf32>
    %28 = arith.addf %22, %27 : vector<28x168xf32>
    %c0_29 = arith.constant 0 : index
    %c0_30 = arith.constant 0 : index
    %29 = vector.load %arg3[%c0_29, %c0_30] : memref<1x168xf32, #tpu.memory_space<vmem>>, vector<1x168xf32>
    %30 = vector.broadcast %29 : vector<1x168xf32> to vector<28x168xf32>
    %31 = arith.addf %28, %30 : vector<28x168xf32>
    %cst_31 = arith.constant 0.000000e+00 : f32
    %32 = vector.broadcast %cst_31 : f32 to vector<28x168xf32>
    %33 = arith.maximumf %31, %32 : vector<28x168xf32>
    %c0_32 = arith.constant 0 : index
    %c0_33 = arith.constant 0 : index
    %34 = vector.load %arg4[%c0_32, %c0_33] : memref<14x28xf32, #tpu.memory_space<vmem>>, vector<14x28xf32>
    %cst_34 = arith.constant dense<0.000000e+00> : vector<14x168xf32>
    %35 = tpu.matmul %34, %33, %cst_34 {dimension_numbers = #tpu.dot_dimension_numbers<[1], [0], [0], [1], [0, 0, 1, 1], [], []>} : vector<14x28xf32>, vector<28x168xf32>, vector<14x168xf32> -> vector<14x168xf32>
    %c0_35 = arith.constant 0 : index
    %c0_36 = arith.constant 0 : index
    %36 = vector.load %arg5[%c0_35, %c0_36] : memref<14x28xf32, #tpu.memory_space<vmem>>, vector<14x28xf32>
    %cst_37 = arith.constant dense<0.000000e+00> : vector<14x168xf32>
    %37 = tpu.matmul %36, %33, %cst_37 {dimension_numbers = #tpu.dot_dimension_numbers<[1], [0], [0], [1], [0, 0, 1, 1], [], []>} : vector<14x28xf32>, vector<28x168xf32>, vector<14x168xf32> -> vector<14x168xf32>
    %38 = arith.maximumf %35, %37 : vector<14x168xf32>
    %c0_38 = arith.constant 0 : index
    %c0_39 = arith.constant 0 : index
    %39 = vector.load %arg6[%c0_38, %c0_39] : memref<168x84xf32, #tpu.memory_space<vmem>>, vector<168x84xf32>
    %cst_40 = arith.constant dense<0.000000e+00> : vector<14x84xf32>
    %40 = tpu.matmul %38, %39, %cst_40 {dimension_numbers = #tpu.dot_dimension_numbers<[1], [0], [0], [1], [0, 0, 1, 1], [], []>} : vector<14x168xf32>, vector<168x84xf32>, vector<14x84xf32> -> vector<14x84xf32>
    %c0_41 = arith.constant 0 : index
    %c0_42 = arith.constant 0 : index
    %41 = vector.load %arg7[%c0_41, %c0_42] : memref<168x84xf32, #tpu.memory_space<vmem>>, vector<168x84xf32>
    %cst_43 = arith.constant dense<0.000000e+00> : vector<14x84xf32>
    %42 = tpu.matmul %38, %41, %cst_43 {dimension_numbers = #tpu.dot_dimension_numbers<[1], [0], [0], [1], [0, 0, 1, 1], [], []>} : vector<14x168xf32>, vector<168x84xf32>, vector<14x84xf32> -> vector<14x84xf32>
    %43 = arith.maximumf %40, %42 : vector<14x84xf32>
    %44 = vector.extract_strided_slice %43 {offsets = [0, 0], sizes = [10, 84], strides = [1, 1]} : vector<14x84xf32> to vector<10x84xf32>
    %c0_44 = arith.constant 0 : index
    %c0_45 = arith.constant 0 : index
    %c0_46 = arith.constant 0 : index
    %45 = vector.load %arg8[%c0_44, %c0_45, %c0_46] : memref<5x84x160xf32, #tpu.memory_space<vmem>>, vector<1x84x160xf32>
    %46 = vector.shape_cast %45 : vector<1x84x160xf32> to vector<84x160xf32>
    %cst_47 = arith.constant dense<0.000000e+00> : vector<10x160xf32>
    %47 = tpu.matmul %44, %46, %cst_47 {dimension_numbers = #tpu.dot_dimension_numbers<[1], [0], [0], [1], [0, 0, 1, 1], [], []>} : vector<10x84xf32>, vector<84x160xf32>, vector<10x160xf32> -> vector<10x160xf32>
    %48 = vector.extract_strided_slice %43 {offsets = [1, 0], sizes = [10, 84], strides = [1, 1]} : vector<14x84xf32> to vector<10x84xf32>
    %c1_48 = arith.constant 1 : index
    %c0_49 = arith.constant 0 : index
    %c0_50 = arith.constant 0 : index
    %49 = vector.load %arg8[%c1_48, %c0_49, %c0_50] : memref<5x84x160xf32, #tpu.memory_space<vmem>>, vector<1x84x160xf32>
    %50 = vector.shape_cast %49 : vector<1x84x160xf32> to vector<84x160xf32>
    %cst_51 = arith.constant dense<0.000000e+00> : vector<10x160xf32>
    %51 = tpu.matmul %48, %50, %cst_51 {dimension_numbers = #tpu.dot_dimension_numbers<[1], [0], [0], [1], [0, 0, 1, 1], [], []>} : vector<10x84xf32>, vector<84x160xf32>, vector<10x160xf32> -> vector<10x160xf32>
    %52 = arith.addf %47, %51 : vector<10x160xf32>
    %53 = vector.extract_strided_slice %43 {offsets = [2, 0], sizes = [10, 84], strides = [1, 1]} : vector<14x84xf32> to vector<10x84xf32>
    %c2_52 = arith.constant 2 : index
    %c0_53 = arith.constant 0 : index
    %c0_54 = arith.constant 0 : index
    %54 = vector.load %arg8[%c2_52, %c0_53, %c0_54] : memref<5x84x160xf32, #tpu.memory_space<vmem>>, vector<1x84x160xf32>
    %55 = vector.shape_cast %54 : vector<1x84x160xf32> to vector<84x160xf32>
    %cst_55 = arith.constant dense<0.000000e+00> : vector<10x160xf32>
    %56 = tpu.matmul %53, %55, %cst_55 {dimension_numbers = #tpu.dot_dimension_numbers<[1], [0], [0], [1], [0, 0, 1, 1], [], []>} : vector<10x84xf32>, vector<84x160xf32>, vector<10x160xf32> -> vector<10x160xf32>
    %57 = arith.addf %52, %56 : vector<10x160xf32>
    %58 = vector.extract_strided_slice %43 {offsets = [3, 0], sizes = [10, 84], strides = [1, 1]} : vector<14x84xf32> to vector<10x84xf32>
    %c3_56 = arith.constant 3 : index
    %c0_57 = arith.constant 0 : index
    %c0_58 = arith.constant 0 : index
    %59 = vector.load %arg8[%c3_56, %c0_57, %c0_58] : memref<5x84x160xf32, #tpu.memory_space<vmem>>, vector<1x84x160xf32>
    %60 = vector.shape_cast %59 : vector<1x84x160xf32> to vector<84x160xf32>
    %cst_59 = arith.constant dense<0.000000e+00> : vector<10x160xf32>
    %61 = tpu.matmul %58, %60, %cst_59 {dimension_numbers = #tpu.dot_dimension_numbers<[1], [0], [0], [1], [0, 0, 1, 1], [], []>} : vector<10x84xf32>, vector<84x160xf32>, vector<10x160xf32> -> vector<10x160xf32>
    %62 = arith.addf %57, %61 : vector<10x160xf32>
    %63 = vector.extract_strided_slice %43 {offsets = [4, 0], sizes = [10, 84], strides = [1, 1]} : vector<14x84xf32> to vector<10x84xf32>
    %c4_60 = arith.constant 4 : index
    %c0_61 = arith.constant 0 : index
    %c0_62 = arith.constant 0 : index
    %64 = vector.load %arg8[%c4_60, %c0_61, %c0_62] : memref<5x84x160xf32, #tpu.memory_space<vmem>>, vector<1x84x160xf32>
    %65 = vector.shape_cast %64 : vector<1x84x160xf32> to vector<84x160xf32>
    %cst_63 = arith.constant dense<0.000000e+00> : vector<10x160xf32>
    %66 = tpu.matmul %63, %65, %cst_63 {dimension_numbers = #tpu.dot_dimension_numbers<[1], [0], [0], [1], [0, 0, 1, 1], [], []>} : vector<10x84xf32>, vector<84x160xf32>, vector<10x160xf32> -> vector<10x160xf32>
    %67 = arith.addf %62, %66 : vector<10x160xf32>
    %c0_64 = arith.constant 0 : index
    %c0_65 = arith.constant 0 : index
    %68 = vector.load %arg9[%c0_64, %c0_65] : memref<1x160xf32, #tpu.memory_space<vmem>>, vector<1x160xf32>
    %69 = vector.broadcast %68 : vector<1x160xf32> to vector<10x160xf32>
    %70 = arith.addf %67, %69 : vector<10x160xf32>
    %cst_66 = arith.constant 0.000000e+00 : f32
    %71 = vector.broadcast %cst_66 : f32 to vector<10x160xf32>
    %72 = arith.maximumf %70, %71 : vector<10x160xf32>
    %c0_67 = arith.constant 0 : index
    %c0_68 = arith.constant 0 : index
    %73 = vector.load %arg10[%c0_67, %c0_68] : memref<5x10xf32, #tpu.memory_space<vmem>>, vector<5x10xf32>
    %cst_69 = arith.constant dense<0.000000e+00> : vector<5x160xf32>
    %74 = tpu.matmul %73, %72, %cst_69 {dimension_numbers = #tpu.dot_dimension_numbers<[1], [0], [0], [1], [0, 0, 1, 1], [], []>} : vector<5x10xf32>, vector<10x160xf32>, vector<5x160xf32> -> vector<5x160xf32>
    %c0_70 = arith.constant 0 : index
    %c0_71 = arith.constant 0 : index
    %75 = vector.load %arg11[%c0_70, %c0_71] : memref<5x10xf32, #tpu.memory_space<vmem>>, vector<5x10xf32>
    %cst_72 = arith.constant dense<0.000000e+00> : vector<5x160xf32>
    %76 = tpu.matmul %75, %72, %cst_72 {dimension_numbers = #tpu.dot_dimension_numbers<[1], [0], [0], [1], [0, 0, 1, 1], [], []>} : vector<5x10xf32>, vector<10x160xf32>, vector<5x160xf32> -> vector<5x160xf32>
    %77 = arith.maximumf %74, %76 : vector<5x160xf32>
    %c0_73 = arith.constant 0 : index
    %c0_74 = arith.constant 0 : index
    %78 = vector.load %arg12[%c0_73, %c0_74] : memref<160x80xf32, #tpu.memory_space<vmem>>, vector<160x80xf32>
    %cst_75 = arith.constant dense<0.000000e+00> : vector<5x80xf32>
    %79 = tpu.matmul %77, %78, %cst_75 {dimension_numbers = #tpu.dot_dimension_numbers<[1], [0], [0], [1], [0, 0, 1, 1], [], []>} : vector<5x160xf32>, vector<160x80xf32>, vector<5x80xf32> -> vector<5x80xf32>
    %c0_76 = arith.constant 0 : index
    %c0_77 = arith.constant 0 : index
    %80 = vector.load %arg13[%c0_76, %c0_77] : memref<160x80xf32, #tpu.memory_space<vmem>>, vector<160x80xf32>
    %cst_78 = arith.constant dense<0.000000e+00> : vector<5x80xf32>
    %81 = tpu.matmul %77, %80, %cst_78 {dimension_numbers = #tpu.dot_dimension_numbers<[1], [0], [0], [1], [0, 0, 1, 1], [], []>} : vector<5x160xf32>, vector<160x80xf32>, vector<5x80xf32> -> vector<5x80xf32>
    %82 = arith.maximumf %79, %81 : vector<5x80xf32>
    %83 = vector.extract_strided_slice %82 {offsets = [0, 0], sizes = [1, 80], strides = [1, 1]} : vector<5x80xf32> to vector<1x80xf32>
    %c0_79 = arith.constant 0 : index
    %c0_80 = arith.constant 0 : index
    %c0_81 = arith.constant 0 : index
    %84 = vector.load %arg14[%c0_79, %c0_80, %c0_81] : memref<5x80x120xf32, #tpu.memory_space<vmem>>, vector<1x80x120xf32>
    %85 = vector.shape_cast %84 : vector<1x80x120xf32> to vector<80x120xf32>
    %cst_82 = arith.constant dense<0.000000e+00> : vector<1x120xf32>
    %86 = tpu.matmul %83, %85, %cst_82 {dimension_numbers = #tpu.dot_dimension_numbers<[1], [0], [0], [1], [0, 0, 1, 1], [], []>} : vector<1x80xf32>, vector<80x120xf32>, vector<1x120xf32> -> vector<1x120xf32>
    %87 = vector.extract_strided_slice %82 {offsets = [1, 0], sizes = [1, 80], strides = [1, 1]} : vector<5x80xf32> to vector<1x80xf32>
    %c1_83 = arith.constant 1 : index
    %c0_84 = arith.constant 0 : index
    %c0_85 = arith.constant 0 : index
    %88 = vector.load %arg14[%c1_83, %c0_84, %c0_85] : memref<5x80x120xf32, #tpu.memory_space<vmem>>, vector<1x80x120xf32>
    %89 = vector.shape_cast %88 : vector<1x80x120xf32> to vector<80x120xf32>
    %cst_86 = arith.constant dense<0.000000e+00> : vector<1x120xf32>
    %90 = tpu.matmul %87, %89, %cst_86 {dimension_numbers = #tpu.dot_dimension_numbers<[1], [0], [0], [1], [0, 0, 1, 1], [], []>} : vector<1x80xf32>, vector<80x120xf32>, vector<1x120xf32> -> vector<1x120xf32>
    %91 = arith.addf %86, %90 : vector<1x120xf32>
    %92 = vector.extract_strided_slice %82 {offsets = [2, 0], sizes = [1, 80], strides = [1, 1]} : vector<5x80xf32> to vector<1x80xf32>
    %c2_87 = arith.constant 2 : index
    %c0_88 = arith.constant 0 : index
    %c0_89 = arith.constant 0 : index
    %93 = vector.load %arg14[%c2_87, %c0_88, %c0_89] : memref<5x80x120xf32, #tpu.memory_space<vmem>>, vector<1x80x120xf32>
    %94 = vector.shape_cast %93 : vector<1x80x120xf32> to vector<80x120xf32>
    %cst_90 = arith.constant dense<0.000000e+00> : vector<1x120xf32>
    %95 = tpu.matmul %92, %94, %cst_90 {dimension_numbers = #tpu.dot_dimension_numbers<[1], [0], [0], [1], [0, 0, 1, 1], [], []>} : vector<1x80xf32>, vector<80x120xf32>, vector<1x120xf32> -> vector<1x120xf32>
    %96 = arith.addf %91, %95 : vector<1x120xf32>
    %97 = vector.extract_strided_slice %82 {offsets = [3, 0], sizes = [1, 80], strides = [1, 1]} : vector<5x80xf32> to vector<1x80xf32>
    %c3_91 = arith.constant 3 : index
    %c0_92 = arith.constant 0 : index
    %c0_93 = arith.constant 0 : index
    %98 = vector.load %arg14[%c3_91, %c0_92, %c0_93] : memref<5x80x120xf32, #tpu.memory_space<vmem>>, vector<1x80x120xf32>
    %99 = vector.shape_cast %98 : vector<1x80x120xf32> to vector<80x120xf32>
    %cst_94 = arith.constant dense<0.000000e+00> : vector<1x120xf32>
    %100 = tpu.matmul %97, %99, %cst_94 {dimension_numbers = #tpu.dot_dimension_numbers<[1], [0], [0], [1], [0, 0, 1, 1], [], []>} : vector<1x80xf32>, vector<80x120xf32>, vector<1x120xf32> -> vector<1x120xf32>
    %101 = arith.addf %96, %100 : vector<1x120xf32>
    %102 = vector.extract_strided_slice %82 {offsets = [4, 0], sizes = [1, 80], strides = [1, 1]} : vector<5x80xf32> to vector<1x80xf32>
    %c4_95 = arith.constant 4 : index
    %c0_96 = arith.constant 0 : index
    %c0_97 = arith.constant 0 : index
    %103 = vector.load %arg14[%c4_95, %c0_96, %c0_97] : memref<5x80x120xf32, #tpu.memory_space<vmem>>, vector<1x80x120xf32>
    %104 = vector.shape_cast %103 : vector<1x80x120xf32> to vector<80x120xf32>
    %cst_98 = arith.constant dense<0.000000e+00> : vector<1x120xf32>
    %105 = tpu.matmul %102, %104, %cst_98 {dimension_numbers = #tpu.dot_dimension_numbers<[1], [0], [0], [1], [0, 0, 1, 1], [], []>} : vector<1x80xf32>, vector<80x120xf32>, vector<1x120xf32> -> vector<1x120xf32>
    %106 = arith.addf %101, %105 : vector<1x120xf32>
    %c0_99 = arith.constant 0 : index
    %c0_100 = arith.constant 0 : index
    %107 = vector.load %arg15[%c0_99, %c0_100] : memref<1x120xf32, #tpu.memory_space<vmem>>, vector<1x120xf32>
    %108 = arith.addf %106, %107 : vector<1x120xf32>
    %cst_101 = arith.constant 0.000000e+00 : f32
    %109 = vector.broadcast %cst_101 : f32 to vector<1x120xf32>
    %110 = arith.maximumf %108, %109 : vector<1x120xf32>
    %c0_102 = arith.constant 0 : index
    %c0_103 = arith.constant 0 : index
    %111 = vector.load %arg16[%c0_102, %c0_103] : memref<120x84xf32, #tpu.memory_space<vmem>>, vector<120x84xf32>
    %cst_104 = arith.constant dense<0.000000e+00> : vector<1x84xf32>
    %112 = tpu.matmul %110, %111, %cst_104 {dimension_numbers = #tpu.dot_dimension_numbers<[1], [0], [0], [1], [0, 0, 1, 1], [], []>} : vector<1x120xf32>, vector<120x84xf32>, vector<1x84xf32> -> vector<1x84xf32>
    %c0_105 = arith.constant 0 : index
    %c0_106 = arith.constant 0 : index
    %113 = vector.load %arg17[%c0_105, %c0_106] : memref<1x84xf32, #tpu.memory_space<vmem>>, vector<1x84xf32>
    %114 = arith.addf %112, %113 : vector<1x84xf32>
    %cst_107 = arith.constant 0.000000e+00 : f32
    %115 = vector.broadcast %cst_107 : f32 to vector<1x84xf32>
    %116 = arith.maximumf %114, %115 : vector<1x84xf32>
    %c0_108 = arith.constant 0 : index
    %c0_109 = arith.constant 0 : index
    %117 = vector.load %arg18[%c0_108, %c0_109] : memref<84x128xf32, #tpu.memory_space<vmem>>, vector<84x128xf32>
    %cst_110 = arith.constant dense<0.000000e+00> : vector<1x128xf32>
    %118 = tpu.matmul %116, %117, %cst_110 {dimension_numbers = #tpu.dot_dimension_numbers<[1], [0], [0], [1], [0, 0, 1, 1], [], []>} : vector<1x84xf32>, vector<84x128xf32>, vector<1x128xf32> -> vector<1x128xf32>
    %c0_111 = arith.constant 0 : index
    %c0_112 = arith.constant 0 : index
    %119 = vector.load %arg19[%c0_111, %c0_112] : memref<1x128xf32, #tpu.memory_space<vmem>>, vector<1x128xf32>
    %120 = arith.addf %118, %119 : vector<1x128xf32>
    %c0_113 = arith.constant 0 : index
    %c0_114 = arith.constant 0 : index
    %c0_115 = arith.constant 0 : index
    %121 = vector.load %arg20[%c0_113, %c0_114, %c0_115] : memref<1x1x128xf32, #tpu.memory_space<vmem>>, vector<1x1x128xf32>
    %122 = vector.shape_cast %121 : vector<1x1x128xf32> to vector<1x128xf32>
    %123 = vector.shape_cast %120 : vector<1x128xf32> to vector<1x1x128xf32>
    tpu.vector_store %arg20[%c0_113, %c0_114, %c0_115], %123 {strides = array<i32>} : memref<1x1x128xf32, #tpu.memory_space<vmem>>, vector<1x1x128xf32>,
    return
  }
  func.func @transform_0(%arg0: i32) -> (i32, i32, i32) {
    %c0_i32 = arith.constant 0 : i32
    %c0_i32_0 = arith.constant 0 : i32
    %c0_i32_1 = arith.constant 0 : i32
    return %arg0, %c0_i32, %c0_i32_0 : i32, i32, i32
  }
  func.func @transform_1(%arg0: i32) -> (i32, i32, i32) {
    %c0_i32 = arith.constant 0 : i32
    %c0_i32_0 = arith.constant 0 : i32
    %c0_i32_1 = arith.constant 0 : i32
    %c0_i32_2 = arith.constant 0 : i32
    return %c0_i32, %c0_i32_0, %c0_i32_1 : i32, i32, i32
  }
  func.func @transform_2(%arg0: i32) -> (i32, i32) {
    %c0_i32 = arith.constant 0 : i32
    %c0_i32_0 = arith.constant 0 : i32
    %c0_i32_1 = arith.constant 0 : i32
    return %c0_i32, %c0_i32_0 : i32, i32
  }
  func.func @transform_3(%arg0: i32) -> (i32, i32) {
    %c0_i32 = arith.constant 0 : i32
    %c0_i32_0 = arith.constant 0 : i32
    %c0_i32_1 = arith.constant 0 : i32
    return %c0_i32, %c0_i32_0 : i32, i32
  }
  func.func @transform_4(%arg0: i32) -> (i32, i32) {
    %c0_i32 = arith.constant 0 : i32
    %c0_i32_0 = arith.constant 0 : i32
    %c0_i32_1 = arith.constant 0 : i32
    return %c0_i32, %c0_i32_0 : i32, i32
  }
  func.func @transform_5(%arg0: i32) -> (i32, i32) {
    %c0_i32 = arith.constant 0 : i32
    %c0_i32_0 = arith.constant 0 : i32
    %c0_i32_1 = arith.constant 0 : i32
    return %c0_i32, %c0_i32_0 : i32, i32
  }
  func.func @transform_6(%arg0: i32) -> (i32, i32) {
    %c0_i32 = arith.constant 0 : i32
    %c0_i32_0 = arith.constant 0 : i32
    %c0_i32_1 = arith.constant 0 : i32
    return %c0_i32, %c0_i32_0 : i32, i32
  }
  func.func @transform_7(%arg0: i32) -> (i32, i32, i32) {
    %c0_i32 = arith.constant 0 : i32
    %c0_i32_0 = arith.constant 0 : i32
    %c0_i32_1 = arith.constant 0 : i32
    %c0_i32_2 = arith.constant 0 : i32
    return %c0_i32, %c0_i32_0, %c0_i32_1 : i32, i32, i32
  }
  func.func @transform_8(%arg0: i32) -> (i32, i32) {
    %c0_i32 = arith.constant 0 : i32
    %c0_i32_0 = arith.constant 0 : i32
    %c0_i32_1 = arith.constant 0 : i32
    return %c0_i32, %c0_i32_0 : i32, i32
  }
  func.func @transform_9(%arg0: i32) -> (i32, i32) {
    %c0_i32 = arith.constant 0 : i32
    %c0_i32_0 = arith.constant 0 : i32
    %c0_i32_1 = arith.constant 0 : i32
    return %c0_i32, %c0_i32_0 : i32, i32
  }
  func.func @transform_10(%arg0: i32) -> (i32, i32) {
    %c0_i32 = arith.constant 0 : i32
    %c0_i32_0 = arith.constant 0 : i32
    %c0_i32_1 = arith.constant 0 : i32
    return %c0_i32, %c0_i32_0 : i32, i32
  }
  func.func @transform_11(%arg0: i32) -> (i32, i32) {
    %c0_i32 = arith.constant 0 : i32
    %c0_i32_0 = arith.constant 0 : i32
    %c0_i32_1 = arith.constant 0 : i32
    return %c0_i32, %c0_i32_0 : i32, i32
  }
  func.func @transform_12(%arg0: i32) -> (i32, i32) {
    %c0_i32 = arith.constant 0 : i32
    %c0_i32_0 = arith.constant 0 : i32
    %c0_i32_1 = arith.constant 0 : i32
    return %c0_i32, %c0_i32_0 : i32, i32
  }
  func.func @transform_13(%arg0: i32) -> (i32, i32, i32) {
    %c0_i32 = arith.constant 0 : i32
    %c0_i32_0 = arith.constant 0 : i32
    %c0_i32_1 = arith.constant 0 : i32
    %c0_i32_2 = arith.constant 0 : i32
    return %c0_i32, %c0_i32_0, %c0_i32_1 : i32, i32, i32
  }
  func.func @transform_14(%arg0: i32) -> (i32, i32) {
    %c0_i32 = arith.constant 0 : i32
    %c0_i32_0 = arith.constant 0 : i32
    %c0_i32_1 = arith.constant 0 : i32
    return %c0_i32, %c0_i32_0 : i32, i32
  }
  func.func @transform_15(%arg0: i32) -> (i32, i32) {
    %c0_i32 = arith.constant 0 : i32
    %c0_i32_0 = arith.constant 0 : i32
    %c0_i32_1 = arith.constant 0 : i32
    return %c0_i32, %c0_i32_0 : i32, i32
  }
  func.func @transform_16(%arg0: i32) -> (i32, i32) {
    %c0_i32 = arith.constant 0 : i32
    %c0_i32_0 = arith.constant 0 : i32
    %c0_i32_1 = arith.constant 0 : i32
    return %c0_i32, %c0_i32_0 : i32, i32
  }
  func.func @transform_17(%arg0: i32) -> (i32, i32) {
    %c0_i32 = arith.constant 0 : i32
    %c0_i32_0 = arith.constant 0 : i32
    %c0_i32_1 = arith.constant 0 : i32
    return %c0_i32, %c0_i32_0 : i32, i32
  }
  func.func @transform_18(%arg0: i32) -> (i32, i32) {
    %c0_i32 = arith.constant 0 : i32
    %c0_i32_0 = arith.constant 0 : i32
    %c0_i32_1 = arith.constant 0 : i32
    return %c0_i32, %c0_i32_0 : i32, i32
  }
  func.func @transform_19(%arg0: i32) -> (i32, i32, i32) {
    %c0_i32 = arith.constant 0 : i32
    %c0_i32_0 = arith.constant 0 : i32
    %c0_i32_1 = arith.constant 0 : i32
    return %arg0, %c0_i32, %c0_i32_0 : i32, i32, i32
  }
}

</mosaic_0001>

<bundles_post_ra>
// kernel: net_forward.1
= control target key start
LH: loop header
LB: loop body
LE: loop exit
PB: predicated region body
PF: predicated region fallthrough
CT: control target
= control target key end

     0   :  { %s4347_s0 = inlined_call_operand.vmem [shape: f32[2,32,96], index: 0, kind: input, shape index: {}]   ;;  %s4348_s1 = inlined_call_operand.vmem [shape: f32[5,96,168], index: 1, kind: input, shape index: {}]   ;;  %s4349_s2 = inlined_call_operand.vmem [shape: f32[1,168], index: 2, kind: input, shape index: {}]   ;;  %s4350_s3 = inlined_call_operand.vmem [shape: f32[14,28], index: 3, kind: input, shape index: {}]   ;;  %s4351_s4 = inlined_call_operand.vmem [shape: f32[14,28], index: 4, kind: input, shape index: {}]   ;;  %s4352_s5 = inlined_call_operand.vmem [shape: f32[168,84], index: 5, kind: input, shape index: {}]   ;;  %s4353_s6 = inlined_call_operand.vmem [shape: f32[168,84], index: 6, kind: input, shape index: {}]   ;;  %s4354_s7 = inlined_call_operand.vmem [shape: f32[5,84,160], index: 7, kind: input, shape index: {}]   ;;  %s4355_s8 = inlined_call_operand.vmem [shape: f32[1,160], index: 8, kind: input, shape index: {}]   ;;  %s4356_s9 = inlined_call_operand.vmem [shape: f32[5,10], index: 9, kind: input, shape index: {}]   ;;  %s4357_s10 = inlined_call_operand.vmem [shape: f32[5,10], index: 10, kind: input, shape index: {}]   ;;  %s4358_s11 = inlined_call_operand.vmem [shape: f32[160,80], index: 11, kind: input, shape index: {}]   ;;  %s4359_s12 = inlined_call_operand.vmem [shape: f32[160,80], index: 12, kind: input, shape index: {}]   ;;  %s4360_s13 = inlined_call_operand.vmem [shape: f32[5,80,120], index: 13, kind: input, shape index: {}]   ;;  %s4361_s14 = inlined_call_operand.vmem [shape: f32[1,120], index: 14, kind: input, shape index: {}]   ;;  %s4362_s15 = inlined_call_operand.vmem [shape: f32[120,84], index: 15, kind: input, shape index: {}]   ;;  %s4363_s16 = inlined_call_operand.vmem [shape: f32[1,84], index: 16, kind: input, shape index: {}]   ;;  %s4364_s17 = inlined_call_operand.vmem [shape: f32[84,128], index: 17, kind: input, shape index: {}]   ;;  %s4365_s18 = inlined_call_operand.vmem [shape: f32[1,128], index: 18, kind: input, shape index: {}]   ;;  %s4366_s19 = inlined_call_operand.hbm [shape: f32[2,1,128], index: 19, kind: output, shape index: {}]  }
   0x1   :  { %4377 = sst [smem:[#allocation12_spill]] %s4347_s0 }
   0x2   :  { %4378 = sst [smem:[#allocation13_spill]] %s4348_s1 }
   0x3   :  { %4379 = sst [smem:[#allocation14_spill]] %s4349_s2 }
   0x4   :  { %4380 = sst [smem:[#allocation15_spill]] %s4350_s3 }
   0x5   :  { %4381 = sst [smem:[#allocation16_spill]] %s4351_s4 }
   0x6   :  { %4382 = sst [smem:[#allocation17_spill]] %s4352_s5 }
   0x7   :  { %4383 = sst [smem:[#allocation18_spill]] %s4365_s18 }
   0x8   :  { %24 = vsyncpa [#allocation3], 0 }
   0x9   :  { %26 = vsyncpa [#allocation3 + $0x1], 0  ;;  %s2929_s0 = smov 0   ;;  %s2931_s30 = smov 0  }
   0xa   :  { %s2933_s20 = smov 0   ;;  %s2935_s21 = smov 0  }
   0xb LB: > { %4384 = sst [smem:[#allocation5_spill]] %s2815_s0  ;;  %s2950_s1 = sadd.s32 4294967295, %s2827_s21   ;;  %s2827_s21 = sphi %s2935_s21, %s4404_s21   ;;  %s2823_s20 = sphi %s2933_s20, %s4406_s20   ;;  %s2819_s30 = sphi %s2931_s30, %s4408_s30   ;;  %s2815_s0 = sphi %s2929_s0, %s4407_s0  }
   0xc   : > { %4385 = sst [smem:[#allocation6_spill]] %s2823_s20  ;;  %s2389_s22 = sadd.s32 4294967294, %s2827_s21  }
   0xd   : > { %4386 = sst [smem:[#allocation7_spill]] %s2827_s21  ;;  %s2954_s2 = sadd.s32 1, %s2827_s21  }
   0xe   : > { %4387 = sst [smem:[#allocation8_spill]] %s2954_s2  ;;  %s443_s23 = sadd.s32 1, %s2823_s20 }
   0xf   : > { %s440_s24 = ssub.s32 %s2827_s21, %s2954_s2  ;;  %p453_p0 = scmp.ne.s32.totalorder %s2823_s20, %s2819_s30 }
  0x10   : > { %p441_p1 = scmp.eq.s32.totalorder %s440_s24, 0  ;;  %p454_p2 = scmp.eq.s32.totalorder %s2950_s1, 1 }
  0x11   : > { %p459_p3 = scmp.ne.s32.totalorder %s2819_s30, %s2815_s0  ;;  %p460_p4 = scmp.eq.s32.totalorder %s2389_s22, 1 }
  0x12   : > { %s2965_s25 = scalar_select %p441_p1, %s2823_s20, %s443_s23  }
  0x13   : > { %p2967_p5 = por %p454_p2, %p453_p0  ;;  %p2971_p6 = por %p460_p4, %p459_p3 }
  0x14   : > { %4388 = sst [smem:[#allocation9_spill]] %s2965_s25  ;;  %p2392_p7 = scmp.ge.s32.totalorder %s2827_s21, 1 }
  0x15   : > { %s4389_s3 = scalar_select %p2967_p5, 1, 0 }
  0x16   : > { %s4391_s26 = scalar_select %p2971_p6, 1, 0 }
  0x17   : > { %4390 = sst [smem:[#allocation10_spill]] %s4389_s3  ;;  %p540_p8 = scmp.lt.s32.totalorder %s2827_s21, 3 }
  0x18   : > { %4392 = sst [smem:[#allocation11_spill]] %s4391_s26 }
  0x19   : > { %p541_p9 = pnand %p2392_p7, %p540_p8 }
  0x1a   : > { %s4393_s29 = sld [smem:[#allocation13_spill]] (!%p541_p9)  ;;  %p595_p10 = scmp.lt.s32.totalorder (!%p541_p9), %s2950_s1, 1 }
  0x1b   : > { %544 = sbr.rel (%p541_p9) target bundleno = 1465 (0x5b9), region = 96  ;;  %s4394_s18 = sld [smem:[#allocation12_spill]] (!%p541_p9) }
  0x1c   : > { %s4395_s21 = sld [smem:[#allocation14_spill]] (!%p541_p9)  ;;  %s593_s24 = sand.u32 (!%p541_p9), 1, %s2819_s30  }
  0x1d   : > { %s4396_s5 = sld [smem:[#allocation17_spill]] (!%p541_p9)  ;;  %s594_s0 = scalar_lea.vmem (!%p541_p9), [#allocation2], %s593_s24 }
  0x1e   : > { %s4398_s4 = sld [smem:[#allocation16_spill]] (!%p541_p9)  ;;  %s2322_s26 = scalar_lea.sflag (!%p541_p9), [#allocation3], %s593_s24 }
  0x1f   : > { %s2785_s25 = scalar_lea.hbm (!%p541_p9), %s4366_s19, 2 }
  0x20   : > { %v2417_v0 = vld [vmem:[%s4393_s29 + $0x170] sm:$0xff]  ;;  %v2418_v1 = vld [vmem:[%s4393_s29 + $0x178] sm:$0xff]  ;;  %v2415_v4 = vld [vmem:[%s4393_s29 + $0x160] sm:$0xff]  ;;  %s3071_s27 = scalar_select %p595_p10, %s2950_s1, 1  ;;  %vm657_vm0 = vcmask 785408   ;;  %vm1150_vm1 = vcmask 1043456  }
  0x21   : > { %v626_v2 = vld [vmem:[%s4393_s29 + $0xb0] sm:$0xff]  ;;  %674 = vmatpush.msra.mxu0 %v2417_v0  ;;  %703 = vmatpush.msra.mxu1 %v2418_v1  ;;  %v627_v3 = vld [vmem:[%s4393_s29 + $0xb8] sm:$0xff]  ;;  %v2416_v5 = vld [vmem:[%s4393_s29 + $0x168] sm:$0xff]  ;;  %vm1143_vm2 = vcmask 228352   ;;  %vm1282_vm3 = vcmask 326656   ;;  %vm1455_vm4 = vcmask 687104  }
  0x22   : > { %744 = vmatpush.msra.mxu2 %v626_v2  ;;  %773 = vmatpush.msra.mxu3 %v627_v3  ;;  %v624_v6 = vld [vmem:[%s4393_s29 + $0xa0] sm:$0xff]  ;;  %v625_v7 = vld [vmem:[%s4393_s29 + $0xa8] sm:$0xff]  ;;  %v2413_v8 = vld [vmem:[%s4393_s29 + $0x150] sm:$0xff]  ;;  %s2725_s2 = sshll.u32 %s3071_s27, 5  ;;  %vm1451_vm5 = vcmask 1046528   ;;  %vm1678_vm6 = vcmask 1044480   ;;  %s2330_s27 = scalar_lea.hbm %s4366_s19, %s2950_s1 }
  0x23   : > { %675 = vmatpush.msra.mxu0 %v2415_v4  ;;  %704 = vmatpush.msra.mxu1 %v2416_v5  ;;  %v2414_v9 = vld [vmem:[%s4393_s29 + $0x158] sm:$0xff]  ;;  %v622_v10 = vld [vmem:[%s4393_s29 + $0x90] sm:$0xff]  ;;  %v2411_v12 = vld [vmem:[%s4393_s29 + $0x140] sm:$0xff]  ;;  %s3119_s3 = scalar_lea.vmem %s4394_s18, %s2725_s2  ;;  %s4397_s18 = sld [smem:[#allocation15_spill]]  ;;  %vm1591_vm7 = vcmask 1045504   ;;  %vm1847_vm8 = vcmask 1041408  }
  0x24   : > { %v623_v11 = vld [vmem:[%s4393_s29 + $0x98] sm:$0xff]  ;;  %745 = vmatpush.msra.mxu2 %v624_v6  ;;  %774 = vmatpush.msra.mxu3 %v625_v7  ;;  %v2412_v13 = vld [vmem:[%s4393_s29 + $0x148] sm:$0xff]  ;;  %v620_v14 = vld [vmem:[%s4393_s29 + $0x80] sm:$0xff]  ;;  %vm1843_vm9 = vcmask 80896   ;;  %vm1960_vm10 = vcmask 261120   ;;  %vm2088_vm11 = vcmask 654336  }
  0x25   : > { %676 = vmatpush.msra.mxu0 %v2413_v8  ;;  %705 = vmatpush.msra.mxu1 %v2414_v9  ;;  %v621_v15 = vld [vmem:[%s4393_s29 + $0x88] sm:$0xff]  ;;  %v2409_v16 = vld [vmem:[%s4393_s29 + $0x130] sm:$0xff]  ;;  %v2410_v17 = vld [vmem:[%s4393_s29 + $0x138] sm:$0xff]  ;;  %vm2257_vm12 = vcmask 982016  }
  0x26   : > { %746 = vmatpush.msra.mxu2 %v622_v10  ;;  %775 = vmatpush.msra.mxu3 %v623_v11  ;;  %v618_v18 = vld [vmem:[%s4393_s29 + $0x70] sm:$0xff]  ;;  %v619_v19 = vld [vmem:[%s4393_s29 + $0x78] sm:$0xff]  ;;  %v2407_v20 = vld [vmem:[%s4393_s29 + $0x120] sm:$0xff] }
  0x27   : > { %677 = vmatpush.msra.mxu0 %v2411_v12  ;;  %706 = vmatpush.msra.mxu1 %v2412_v13  ;;  %v2408_v21 = vld [vmem:[%s4393_s29 + $0x128] sm:$0xff]  ;;  %v616_v22 = vld [vmem:[%s4393_s29 + $0x60] sm:$0xff]  ;;  %v2405_v24 = vld [vmem:[%s4393_s29 + $0x110] sm:$0xff] }
  0x28   : > { %747 = vmatpush.msra.mxu2 %v620_v14  ;;  %776 = vmatpush.msra.mxu3 %v621_v15  ;;  %v617_v23 = vld [vmem:[%s4393_s29 + $0x68] sm:$0xff]  ;;  %v2406_v25 = vld [vmem:[%s4393_s29 + $0x118] sm:$0xff]  ;;  %v614_v26 = vld [vmem:[%s4393_s29 + $0x50] sm:$0xff] }
  0x29   : > { %678 = vmatpush.msra.mxu0 %v2409_v16  ;;  %707 = vmatpush.msra.mxu1 %v2410_v17  ;;  %v615_v27 = vld [vmem:[%s4393_s29 + $0x58] sm:$0xff]  ;;  %v2403_v28 = vld [vmem:[%s4393_s29 + $0x100] sm:$0xff]  ;;  %v2404_v29 = vld [vmem:[%s4393_s29 + $0x108] sm:$0xff] }
  0x2a   : > { %748 = vmatpush.msra.mxu2 %v618_v18  ;;  %777 = vmatpush.msra.mxu3 %v619_v19  ;;  %v612_v30 = vld [vmem:[%s4393_s29 + $0x40] sm:$0xff]  ;;  %v613_v31 = vld [vmem:[%s4393_s29 + $0x48] sm:$0xff]  ;;  %v2401_v32 = vld [vmem:[%s4393_s29 + $0xf0] sm:$0xff] }
  0x2b   : > { %679 = vmatpush.msra.mxu0 %v2407_v20  ;;  %708 = vmatpush.msra.mxu1 %v2408_v21  ;;  %v2402_v33 = vld [vmem:[%s4393_s29 + $0xf8] sm:$0xff]  ;;  %v610_v34 = vld [vmem:[%s4393_s29 + $0x30] sm:$0xff]  ;;  %v2399_v36 = vld [vmem:[%s4393_s29 + $0xe0] sm:$0xff] }
  0x2c   : > { %749 = vmatpush.msra.mxu2 %v616_v22  ;;  %778 = vmatpush.msra.mxu3 %v617_v23  ;;  %v611_v35 = vld [vmem:[%s4393_s29 + $0x38] sm:$0xff]  ;;  %v2400_v37 = vld [vmem:[%s4393_s29 + $0xe8] sm:$0xff]  ;;  %v608_v38 = vld [vmem:[%s4393_s29 + $0x20] sm:$0xff] }
  0x2d   : > { %680 = vmatpush.msra.mxu0 %v2405_v24  ;;  %709 = vmatpush.msra.mxu1 %v2406_v25  ;;  %v609_v39 = vld [vmem:[%s4393_s29 + $0x28] sm:$0xff]  ;;  %v2397_v40 = vld [vmem:[%s4393_s29 + $0xd0] sm:$0xff]  ;;  %v2398_v41 = vld [vmem:[%s4393_s29 + $0xd8] sm:$0xff] }
  0x2e   : > { %750 = vmatpush.msra.mxu2 %v614_v26  ;;  %779 = vmatpush.msra.mxu3 %v615_v27  ;;  %v606_v42 = vld [vmem:[%s4393_s29 + $0x10] sm:$0xff]  ;;  %v607_v43 = vld [vmem:[%s4393_s29 + $0x18] sm:$0xff]  ;;  %v2395_v44 = vld [vmem:[%s4393_s29 + $0xc0] sm:$0xff] }
  0x2f   : > { %681 = vmatpush.msra.mxu0 %v2403_v28  ;;  %710 = vmatpush.msra.mxu1 %v2404_v29  ;;  %v2396_v45 = vld [vmem:[%s4393_s29 + $0xc8] sm:$0xff]  ;;  %v604_v46 = vld [vmem:[%s4393_s29] sm:$0xff]  ;;  %v2457_v50 = vld [vmem:[%s4393_s29 + $0x230] sm:$0xff] }
  0x30   : > { %751 = vmatpush.msra.mxu2 %v612_v30  ;;  %780 = vmatpush.msra.mxu3 %v613_v31  ;;  %v605_v47 = vld [vmem:[%s4393_s29 + $0x8] sm:$0xff]  ;;  %v600_v49 = vld [vmem:[%s3119_s3] sm:$0xff]  ;;  %v2458_v51 = vld [vmem:[%s4393_s29 + $0x238] sm:$0xff] }
  0x31   : > { %682 = vmatpush.msra.mxu0 %v2401_v32  ;;  %711 = vmatpush.msra.mxu1 %v2402_v33  ;;  %v628_v48 = vld [vmem:[%s3119_s3 + $0x1] sm:$0xff]  ;;  %v2489_v52 = vld [vmem:[%s4393_s29 + $0x2f0] sm:$0xff]  ;;  %v2490_v53 = vld [vmem:[%s4393_s29 + $0x2f8] sm:$0xff] }
  0x32   : > { %752 = vmatpush.msra.mxu2 %v610_v34  ;;  %781 = vmatpush.msra.mxu3 %v611_v35  ;;  %v2455_v54 = vld [vmem:[%s4393_s29 + $0x220] sm:$0xff]  ;;  %v2456_v55 = vld [vmem:[%s4393_s29 + $0x228] sm:$0xff]  ;;  %v2453_v58 = vld [vmem:[%s4393_s29 + $0x210] sm:$0xff] }
  0x33   : > { %683 = vmatpush.msra.mxu0 %v2399_v36  ;;  %712 = vmatpush.msra.mxu1 %v2400_v37  ;;  %v2487_v56 = vld [vmem:[%s4393_s29 + $0x2e0] sm:$0xff]  ;;  %v2488_v57 = vld [vmem:[%s4393_s29 + $0x2e8] sm:$0xff]  ;;  %v2454_v59 = vld [vmem:[%s4393_s29 + $0x218] sm:$0xff] }
  0x34   : > { %753 = vmatpush.msra.mxu2 %v608_v38  ;;  %782 = vmatpush.msra.mxu3 %v609_v39  ;;  %v2485_v60 = vld [vmem:[%s4393_s29 + $0x2d0] sm:$0xff]  ;;  %v2486_v61 = vld [vmem:[%s4393_s29 + $0x2d8] sm:$0xff]  ;;  %v601_v63 = vld [vmem:[%s3119_s3 + $0x8] sm:$0xff] }
  0x35   : > { %684 = vmatpush.msra.mxu0 %v2397_v40  ;;  %713 = vmatpush.msra.mxu1 %v2398_v41  ;;  %v629_v62 = vld [vmem:[%s3119_s3 + $0x9] sm:$0xff]  ;;  %v2451_v0 = vld [vmem:[%s4393_s29 + $0x200] sm:$0xff]  ;;  %v2450_v5 = vld [vmem:[%s4393_s29 + $0x1f8] sm:$0xff] }
  0x36   : > { %754 = vmatpush.msra.mxu2 %v606_v42  ;;  %783 = vmatpush.msra.mxu3 %v607_v43  ;;  %v2452_v1 = vld [vmem:[%s4393_s29 + $0x208] sm:$0xff]  ;;  %v2483_v2 = vld [vmem:[%s4393_s29 + $0x2c0] sm:$0xff]  ;;  %v2449_v4 = vld [vmem:[%s4393_s29 + $0x1f0] sm:$0xff] }
  0x37   : > { %685 = vmatpush.msra.mxu0 %v2395_v44  ;;  %714 = vmatpush.msra.mxu1 %v2396_v45  ;;  %v2484_v3 = vld [vmem:[%s4393_s29 + $0x2c8] sm:$0xff]  ;;  %v2481_v6 = vld [vmem:[%s4393_s29 + $0x2b0] sm:$0xff]  ;;  %v2482_v7 = vld [vmem:[%s4393_s29 + $0x2b8] sm:$0xff] }
  0x38   : > { %755 = vmatpush.msra.mxu2 %v604_v46  ;;  %784 = vmatpush.msra.mxu3 %v605_v47  ;;  %v2447_v8 = vld [vmem:[%s4393_s29 + $0x1e0] sm:$0xff]  ;;  %v2448_v9 = vld [vmem:[%s4393_s29 + $0x1e8] sm:$0xff]  ;;  %v630_v12 = vld [vmem:[%s3119_s3 + $0x11] sm:$0xff] }
  0x39   : > { %2419 = vmatmul.msk.f32.vlgmr.msra.gmra.mxu0 %vm657_vm0, %v628_v48  ;;  %2423 = vmatmul.msk.f32.vlgmr.msra.gmra.mxu1 %vm657_vm0, %v628_v48  ;;  %v2479_v10 = vld [vmem:[%s4393_s29 + $0x2a0] sm:$0xff]  ;;  %v2480_v11 = vld [vmem:[%s4393_s29 + $0x2a8] sm:$0xff]  ;;  %v602_v13 = vld [vmem:[%s3119_s3 + $0x10] sm:$0xff] }
  0x3a   : > { %2427 = vmatmul.msk.f32.vlgmr.msra.gmra.mxu2 %vm657_vm0, %v600_v49  ;;  %2431 = vmatmul.msk.f32.vlgmr.msra.gmra.mxu3 %vm657_vm0, %v600_v49  ;;  %v2445_v14 = vld [vmem:[%s4393_s29 + $0x1d0] sm:$0xff]  ;;  %v2446_v15 = vld [vmem:[%s4393_s29 + $0x1d8] sm:$0xff]  ;;  %v2443_v18 = vld [vmem:[%s4393_s29 + $0x1c0] sm:$0xff] }
  0x3b   : > { %843 = vmatpush.msrb.mxu0 %v2457_v50  ;;  %872 = vmatpush.msrb.mxu1 %v2458_v51  ;;  %v2477_v16 = vld [vmem:[%s4393_s29 + $0x290] sm:$0xff]  ;;  %v2478_v17 = vld [vmem:[%s4393_s29 + $0x298] sm:$0xff]  ;;  %v2444_v19 = vld [vmem:[%s4393_s29 + $0x1c8] sm:$0xff] }
  0x3c   : > { %950 = vmatpush.msrb.mxu2 %v2489_v52  ;;  %979 = vmatpush.msrb.mxu3 %v2490_v53  ;;  %v2475_v20 = vld [vmem:[%s4393_s29 + $0x280] sm:$0xff]  ;;  %v2476_v21 = vld [vmem:[%s4393_s29 + $0x288] sm:$0xff]  ;;  %v2441_v22 = vld [vmem:[%s4393_s29 + $0x1b0] sm:$0xff] }
  0x3d   : > { %844 = vmatpush.msrb.mxu0 %v2455_v54  ;;  %873 = vmatpush.msrb.mxu1 %v2456_v55  ;;  %v2442_v23 = vld [vmem:[%s4393_s29 + $0x1b8] sm:$0xff]  ;;  %v2473_v24 = vld [vmem:[%s4393_s29 + $0x270] sm:$0xff]  ;;  %v2439_v28 = vld [vmem:[%s4393_s29 + $0x1a0] sm:$0xff] }
  0x3e   : > { %951 = vmatpush.msrb.mxu2 %v2487_v56  ;;  %980 = vmatpush.msrb.mxu3 %v2488_v57  ;;  %v2474_v25 = vld [vmem:[%s4393_s29 + $0x278] sm:$0xff]  ;;  %v2440_v29 = vld [vmem:[%s4393_s29 + $0x1a8] sm:$0xff]  ;;  %v2471_v30 = vld [vmem:[%s4393_s29 + $0x260] sm:$0xff] }
  0x3f   : > { %845 = vmatpush.msrb.mxu0 %v2453_v58  ;;  %874 = vmatpush.msrb.mxu1 %v2454_v59  ;;  %v631_v26 = vld [vmem:[%s3119_s3 + $0x19] sm:$0xf]  ;;  %v2472_v31 = vld [vmem:[%s4393_s29 + $0x268] sm:$0xff]  ;;  %v2437_v32 = vld [vmem:[%s4393_s29 + $0x190] sm:$0xff] }
  0x40   : > { %952 = vmatpush.msrb.mxu2 %v2485_v60  ;;  %981 = vmatpush.msrb.mxu3 %v2486_v61  ;;  %v603_v27 = vld [vmem:[%s3119_s3 + $0x18] sm:$0xf]  ;;  %v2469_v34 = vld [vmem:[%s4393_s29 + $0x250] sm:$0xff]  ;;  %v2435_v36 = vld [vmem:[%s4393_s29 + $0x180] sm:$0xff] }
  0x41   : > { %2420 = vmatmul.msk.f32.gmra.mxu0 %vm657_vm0, %v629_v62  ;;  %2424 = vmatmul.msk.f32.gmra.mxu1 %vm657_vm0, %v629_v62  ;;  %v2438_v33 = vld [vmem:[%s4393_s29 + $0x198] sm:$0xff]  ;;  %v2436_v37 = vld [vmem:[%s4393_s29 + $0x188] sm:$0xff]  ;;  %v2467_v38 = vld [vmem:[%s4393_s29 + $0x240] sm:$0xff] }
  0x42   : > { %2428 = vmatmul.msk.f32.gmra.mxu2 %vm657_vm0, %v601_v63  ;;  %2432 = vmatmul.msk.f32.gmra.mxu3 %vm657_vm0, %v601_v63  ;;  %v2470_v35 = vld [vmem:[%s4393_s29 + $0x258] sm:$0xff]  ;;  %v2468_v39 = vld [vmem:[%s4393_s29 + $0x248] sm:$0xff]  ;;  %v2521_v42 = vld [vmem:[%s4393_s29 + $0x3b0] sm:$0xff] }
  0x43   : > { %846 = vmatpush.msrb.mxu0 %v2451_v0  ;;  %875 = vmatpush.msrb.mxu1 %v2452_v1  ;;  %v798_v40 = vld [vmem:[%s3119_s3 + $0x2] sm:$0xff]  ;;  %v2522_v43 = vld [vmem:[%s4393_s29 + $0x3b8] sm:$0xff]  ;;  %v2517_v46 = vld [vmem:[%s4393_s29 + $0x390] sm:$0xff] }
  0x44   : > { %953 = vmatpush.msrb.mxu2 %v2483_v2  ;;  %982 = vmatpush.msrb.mxu3 %v2484_v3  ;;  %v905_v41 = vld [vmem:[%s3119_s3 + $0x3] sm:$0xff]  ;;  %v2518_v47 = vld [vmem:[%s4393_s29 + $0x398] sm:$0xff]  ;;  %v906_v49 = vld [vmem:[%s3119_s3 + $0xb] sm:$0xff] }
  0x45   : > { %847 = vmatpush.msrb.mxu0 %v2449_v4  ;;  %876 = vmatpush.msrb.mxu1 %v2450_v5  ;;  %v2519_v44 = vld [vmem:[%s4393_s29 + $0x3a0] sm:$0xff]  ;;  %v2520_v45 = vld [vmem:[%s4393_s29 + $0x3a8] sm:$0xff]  ;;  %v2513_v52 = vld [vmem:[%s4393_s29 + $0x370] sm:$0xff] }
  0x46   : > { %954 = vmatpush.msrb.mxu2 %v2481_v6  ;;  %983 = vmatpush.msrb.mxu3 %v2482_v7  ;;  %v799_v48 = vld [vmem:[%s3119_s3 + $0xa] sm:$0xff]  ;;  %v2515_v50 = vld [vmem:[%s4393_s29 + $0x380] sm:$0xff]  ;;  %v2514_v53 = vld [vmem:[%s4393_s29 + $0x378] sm:$0xff] }
  0x47   : > { %848 = vmatpush.msrb.mxu0 %v2447_v8  ;;  %877 = vmatpush.msrb.mxu1 %v2448_v9  ;;  %v2516_v51 = vld [vmem:[%s4393_s29 + $0x388] sm:$0xff]  ;;  %v2511_v54 = vld [vmem:[%s4393_s29 + $0x360] sm:$0xff]  ;;  %v800_v56 = vld [vmem:[%s3119_s3 + $0x12] sm:$0xff] }
  0x48   : > { %955 = vmatpush.msrb.mxu2 %v2479_v10  ;;  %984 = vmatpush.msrb.mxu3 %v2480_v11  ;;  %v2512_v55 = vld [vmem:[%s4393_s29 + $0x368] sm:$0xff]  ;;  %v907_v57 = vld [vmem:[%s3119_s3 + $0x13] sm:$0xff]  ;;  %v2507_v60 = vld [vmem:[%s4393_s29 + $0x340] sm:$0xff] }
  0x49   : > { %2421 = vmatmul.msk.f32.gmra.mxu0 %vm657_vm0, %v630_v12  ;;  %2425 = vmatmul.msk.f32.gmra.mxu1 %vm657_vm0, %v630_v12  ;;  %v2509_v58 = vld [vmem:[%s4393_s29 + $0x350] sm:$0xff]  ;;  %v2510_v59 = vld [vmem:[%s4393_s29 + $0x358] sm:$0xff]  ;;  %v2508_v61 = vld [vmem:[%s4393_s29 + $0x348] sm:$0xff] }
  0x4a   : > { %2429 = vmatmul.msk.f32.gmra.mxu2 %vm657_vm0, %v602_v13  ;;  %2433 = vmatmul.msk.f32.gmra.mxu3 %vm657_vm0, %v602_v13  ;;  %v2505_v62 = vld [vmem:[%s4393_s29 + $0x330] sm:$0xff]  ;;  %v2506_v63 = vld [vmem:[%s4393_s29 + $0x338] sm:$0xff]  ;;  %v2503_v2 = vld [vmem:[%s4393_s29 + $0x320] sm:$0xff] }
  0x4b   : > { %849 = vmatpush.msrb.mxu0 %v2445_v14  ;;  %878 = vmatpush.msrb.mxu1 %v2446_v15  ;;  %v801_v0 = vld [vmem:[%s3119_s3 + $0x1a] sm:$0xf]  ;;  %v2504_v3 = vld [vmem:[%s4393_s29 + $0x328] sm:$0xff]  ;;  %v2501_v4 = vld [vmem:[%s4393_s29 + $0x310] sm:$0xff] }
  0x4c   : > { %956 = vmatpush.msrb.mxu2 %v2477_v16  ;;  %985 = vmatpush.msrb.mxu3 %v2478_v17  ;;  %v908_v1 = vld [vmem:[%s3119_s3 + $0x1b] sm:$0xf]  ;;  %v2499_v6 = vld [vmem:[%s4393_s29 + $0x300] sm:$0xff]  ;;  %v2500_v7 = vld [vmem:[%s4393_s29 + $0x308] sm:$0xff] }
  0x4d   : > { %850 = vmatpush.msrb.mxu0 %v2443_v18  ;;  %879 = vmatpush.msrb.mxu1 %v2444_v19  ;;  %v2502_v5 = vld [vmem:[%s4393_s29 + $0x318] sm:$0xff]  ;;  %v1012_v8 = vld [vmem:[%s3119_s3 + $0x4] sm:$0xff]  ;;  %v1013_v9 = vld [vmem:[%s3119_s3 + $0xc] sm:$0xff] }
  0x4e   : > { %957 = vmatpush.msrb.mxu2 %v2475_v20  ;;  %986 = vmatpush.msrb.mxu3 %v2476_v21  ;;  %v1014_v10 = vld [vmem:[%s3119_s3 + $0x14] sm:$0xff]  ;;  %v1015_v11 = vld [vmem:[%s3119_s3 + $0x1c] sm:$0xf]  ;;  %s4400_s3 = sld [smem:[#allocation18_spill]] }
  0x4f   : > { %851 = vmatpush.msrb.mxu0 %v2441_v22  ;;  %880 = vmatpush.msrb.mxu1 %v2442_v23 }
  0x50   : > { %958 = vmatpush.msrb.mxu2 %v2473_v24  ;;  %987 = vmatpush.msrb.mxu3 %v2474_v25 }
  0x51   : > { %2422 = vmatmul.msk.f32.gmra.mxu0 %vm657_vm0, %v631_v26  ;;  %2426 = vmatmul.msk.f32.gmra.mxu1 %vm657_vm0, %v631_v26 }
  0x52   : > { %2430 = vmatmul.msk.f32.gmra.mxu2 %vm657_vm0, %v603_v27  ;;  %2434 = vmatmul.msk.f32.gmra.mxu3 %vm657_vm0, %v603_v27 }
  0x53   : > { %852 = vmatpush.msrb.mxu0 %v2439_v28  ;;  %881 = vmatpush.msrb.mxu1 %v2440_v29 }
  0x54   : > { %959 = vmatpush.msrb.mxu2 %v2471_v30  ;;  %988 = vmatpush.msrb.mxu3 %v2472_v31 }
  0x55   : > { %853 = vmatpush.msrb.mxu0 %v2437_v32  ;;  %882 = vmatpush.msrb.mxu1 %v2438_v33 }
  0x56   : > { %960 = vmatpush.msrb.mxu2 %v2469_v34  ;;  %989 = vmatpush.msrb.mxu3 %v2470_v35 }
  0x57   : > { %854 = vmatpush.msrb.mxu0 %v2435_v36  ;;  %883 = vmatpush.msrb.mxu1 %v2436_v37 }
  0x58   : > { %961 = vmatpush.msrb.mxu2 %v2467_v38  ;;  %990 = vmatpush.msrb.mxu3 %v2468_v39 }
  0x59   : > { %2459 = vmatmul.msk.f32.vlgmr.msrb.gmra.mxu0 %vm657_vm0, %v798_v40  ;;  %2463 = vmatmul.msk.f32.vlgmr.msrb.gmra.mxu1 %vm657_vm0, %v798_v40 }
  0x5a   : > { %2491 = vmatmul.msk.f32.vlgmr.msrb.gmra.mxu2 %vm657_vm0, %v905_v41  ;;  %2495 = vmatmul.msk.f32.vlgmr.msrb.gmra.mxu3 %vm657_vm0, %v905_v41 }
  0x5b   : > { %1057 = vmatpush.msra.mxu0 %v2521_v42  ;;  %1086 = vmatpush.msra.mxu1 %v2522_v43 }
  0x5d   : > { %1058 = vmatpush.msra.mxu0 %v2519_v44  ;;  %1087 = vmatpush.msra.mxu1 %v2520_v45 }
  0x5f   : > { %1059 = vmatpush.msra.mxu0 %v2517_v46  ;;  %1088 = vmatpush.msra.mxu1 %v2518_v47 }
  0x61   : > { %2460 = vmatmul.msk.f32.gmra.mxu0 %vm657_vm0, %v799_v48  ;;  %2464 = vmatmul.msk.f32.gmra.mxu1 %vm657_vm0, %v799_v48 }
  0x62   : > { %2492 = vmatmul.msk.f32.gmra.mxu2 %vm657_vm0, %v906_v49  ;;  %2496 = vmatmul.msk.f32.gmra.mxu3 %vm657_vm0, %v906_v49 }
  0x63   : > { %1060 = vmatpush.msra.mxu0 %v2515_v50  ;;  %1089 = vmatpush.msra.mxu1 %v2516_v51 }
  0x65   : > { %1061 = vmatpush.msra.mxu0 %v2513_v52  ;;  %1090 = vmatpush.msra.mxu1 %v2514_v53 }
  0x67   : > { %1062 = vmatpush.msra.mxu0 %v2511_v54  ;;  %1091 = vmatpush.msra.mxu1 %v2512_v55 }
  0x69   : > { %2461 = vmatmul.msk.f32.gmra.mxu0 %vm657_vm0, %v800_v56  ;;  %2465 = vmatmul.msk.f32.gmra.mxu1 %vm657_vm0, %v800_v56 }
  0x6a   : > { %2493 = vmatmul.msk.f32.gmra.mxu2 %vm657_vm0, %v907_v57  ;;  %2497 = vmatmul.msk.f32.gmra.mxu3 %vm657_vm0, %v907_v57 }
  0x6b   : > { %1063 = vmatpush.msra.mxu0 %v2509_v58  ;;  %1092 = vmatpush.msra.mxu1 %v2510_v59 }
  0x6d   : > { %1064 = vmatpush.msra.mxu0 %v2507_v60  ;;  %1093 = vmatpush.msra.mxu1 %v2508_v61 }
  0x6f   : > { %1065 = vmatpush.msra.mxu0 %v2505_v62  ;;  %1094 = vmatpush.msra.mxu1 %v2506_v63 }
  0x71   : > { %2462 = vmatmul.msk.f32.gmra.mxu0 %vm657_vm0, %v801_v0  ;;  %2466 = vmatmul.msk.f32.gmra.mxu1 %vm657_vm0, %v801_v0 }
  0x72   : > { %2494 = vmatmul.msk.f32.gmra.mxu2 %vm657_vm0, %v908_v1  ;;  %2498 = vmatmul.msk.f32.gmra.mxu3 %vm657_vm0, %v908_v1 }
  0x73   : > { %1066 = vmatpush.msra.mxu0 %v2503_v2  ;;  %1095 = vmatpush.msra.mxu1 %v2504_v3  ;;  %v1119_v2 = vld [vmem:[%s4395_s21] sm:$0x3]  ;;  %s2332_s21 = sshll.u32 %s594_s0, 4  ;;  %s2333_s21 = int_to_ptr.vmem [resolvable:$true] %s2332_s21 }
  0x75   : > { %1067 = vmatpush.msra.mxu0 %v2501_v4  ;;  %1096 = vmatpush.msra.mxu1 %v2502_v5 }
  0x77   : > { %1068 = vmatpush.msra.mxu0 %v2499_v6  ;;  %1097 = vmatpush.msra.mxu1 %v2500_v7 }
  0x79   : > { %2523 = vmatmul.msk.f32.vlgmr.msra.gmra.mxu0 %vm657_vm0, %v1012_v8  ;;  %2527 = vmatmul.msk.f32.vlgmr.msra.gmra.mxu1 %vm657_vm0, %v1012_v8 }
  0x81   : > { %2524 = vmatmul.msk.f32.gmra.mxu0 %vm657_vm0, %v1013_v9  ;;  %2528 = vmatmul.msk.f32.gmra.mxu1 %vm657_vm0, %v1013_v9 }
  0x89   : > { %2525 = vmatmul.msk.f32.gmra.mxu0 %vm657_vm0, %v1014_v10  ;;  %2529 = vmatmul.msk.f32.gmra.mxu1 %vm657_vm0, %v1014_v10 }
  0x91   : > { %2526 = vmatmul.msk.f32.gmra.mxu0 %vm657_vm0, %v1015_v11  ;;  %2530 = vmatmul.msk.f32.gmra.mxu1 %vm657_vm0, %v1015_v11 }
  0xb6   : > { %v687_v12 = vpop.f32.mrf.mxu0  ;;  %v716_v13 = vpop.f32.mrf.mxu1 }
  0xbd   : > { %v757_v16 = vpop.f32.mrf.mxu2  ;;  %v786_v17 = vpop.f32.mrf.mxu3 }
  0xbe   : > { %v690_v14 = vpop.f32.mrf.mxu0  ;;  %v719_v15 = vpop.f32.mrf.mxu1  ;;  %v758_v56 = vadd.f32 %v757_v16, %v687_v12  ;;  %v787_v57 = vadd.f32 %v786_v17, %v716_v13  ;;  %v1121_v13 = vperm.slane %v1119_v2, 0 }
  0xc5   : > { %v760_v20 = vpop.f32.mrf.mxu2  ;;  %v789_v21 = vpop.f32.mrf.mxu3 }
  0xc6   : > { %v693_v18 = vpop.f32.mrf.mxu0  ;;  %v722_v19 = vpop.f32.mrf.mxu1  ;;  %v761_v50 = vadd.f32 %v760_v20, %v690_v14  ;;  %v790_v51 = vadd.f32 %v789_v21, %v719_v15  ;;  %v1122_v14 = vperm.slane %v1119_v2, 1  ;;  %v1339_v2 = vld [vmem:[%s4353_s6 + $0x20] sm:$0xff] }
  0xcd   : > { %v763_v26 = vpop.f32.mrf.mxu2  ;;  %v792_v27 = vpop.f32.mrf.mxu3 }
  0xce   : > { %v696_v22 = vpop.f32.mrf.mxu0  ;;  %v725_v23 = vpop.f32.mrf.mxu1  ;;  %v764_v48 = vadd.f32 %v763_v26, %v693_v18  ;;  %v793_v49 = vadd.f32 %v792_v27, %v722_v19 }
  0xd5   : > { %v766_v30 = vpop.f32.mrf.mxu2  ;;  %v795_v31 = vpop.f32.mrf.mxu3 }
  0xd6   : > { %v856_v24 = vpop.f32.mrf.mxu0  ;;  %v885_v25 = vpop.f32.mrf.mxu1  ;;  %v767_v52 = vadd.f32 %v766_v30, %v696_v22  ;;  %v796_v53 = vadd.f32 %v795_v31, %v725_v23  ;;  %v1276_v31 = vld [vmem:[%s4396_s5 + $0x78] sm:$0xff] }
  0xd7   : > { %v897_v3 = vadd.f32 %v856_v24, %v758_v56  ;;  %v898_v4 = vadd.f32 %v885_v25, %v787_v57  ;;  %1289 = vmatpush.msrb.mxu1 %v1276_v31  ;;  %v1344_v56 = vld [vmem:[%s4353_s6 + $0x48] sm:$0xff]  ;;  %v1269_v57 = vld [vmem:[%s4396_s5 + $0x40] sm:$0xff] }
  0xdd   : > { %v963_v34 = vpop.f32.mrf.mxu2  ;;  %v992_v35 = vpop.f32.mrf.mxu3 }
  0xde   : > { %v859_v28 = vpop.f32.mrf.mxu0  ;;  %v888_v29 = vpop.f32.mrf.mxu1  ;;  %v1004_v11 = vadd.f32 %v963_v34, %v897_v3  ;;  %v1005_v12 = vadd.f32 %v992_v35, %v898_v4  ;;  %v1355_v3 = vld [vmem:[%s4353_s6 + $0xa0] sm:$0xff]  ;;  %v1264_v4 = vld [vmem:[%s4396_s5 + $0x18] sm:$0xff] }
  0xdf   : > { %v899_v58 = vadd.f32 %v859_v28, %v761_v50  ;;  %v900_v59 = vadd.f32 %v888_v29, %v790_v51  ;;  %v1347_v50 = vld [vmem:[%s4353_s6 + $0x60] sm:$0xff] }
  0xe0   : > { %v1203_v51 = vld [vmem:[%s4398_s4] sm:$0xff] }
  0xe5   : > { %v966_v38 = vpop.f32.mrf.mxu2  ;;  %v995_v39 = vpop.f32.mrf.mxu3 }
  0xe6   : > { %v862_v32 = vpop.f32.mrf.mxu0  ;;  %v891_v33 = vpop.f32.mrf.mxu1  ;;  %v1006_v5 = vadd.f32 %v966_v38, %v899_v58  ;;  %v1007_v6 = vadd.f32 %v995_v39, %v900_v59  ;;  %v1274_v39 = vld [vmem:[%s4396_s5 + $0x68] sm:$0xff]  ;;  %v1343_v58 = vld [vmem:[%s4353_s6 + $0x40] sm:$0xff]  ;;  %v1268_v59 = vld [vmem:[%s4396_s5 + $0x38] sm:$0xff] }
  0xe7   : > { %v901_v54 = vadd.f32 %v862_v32, %v764_v48  ;;  %v902_v55 = vadd.f32 %v891_v33, %v793_v49  ;;  %v1349_v48 = vld [vmem:[%s4353_s6 + $0x70] sm:$0xff]  ;;  %v1348_v49 = vld [vmem:[%s4353_s6 + $0x68] sm:$0xff] }
  0xed   : > { %v969_v44 = vpop.f32.mrf.mxu2  ;;  %v998_v45 = vpop.f32.mrf.mxu3 }
  0xee   : > { %v865_v36 = vpop.f32.mrf.mxu0  ;;  %v894_v37 = vpop.f32.mrf.mxu1  ;;  %v1008_v62 = vadd.f32 %v969_v44, %v901_v54  ;;  %v1009_v63 = vadd.f32 %v998_v45, %v902_v55  ;;  %v1272_v44 = vld [vmem:[%s4396_s5 + $0x58] sm:$0xff]  ;;  %v1271_v45 = vld [vmem:[%s4396_s5 + $0x50] sm:$0xff]  ;;  %v1204_v54 = vld [vmem:[%s4398_s4 + $0x8] sm:$0x3f]  ;;  %s2334_s4 = sshll.u32 %s2330_s27, 4  ;;  %s2335_s4 = int_to_ptr.hbm [resolvable:$true] %s2334_s4 }
  0xef   : > { %v903_v0 = vadd.f32 %v865_v36, %v767_v52  ;;  %v904_v1 = vadd.f32 %v894_v37, %v796_v53  ;;  %v1275_v36 = vld [vmem:[%s4396_s5 + $0x70] sm:$0xff]  ;;  %v1346_v52 = vld [vmem:[%s4353_s6 + $0x58] sm:$0xff]  ;;  %v1270_v55 = vld [vmem:[%s4396_s5 + $0x48] sm:$0xff]  ;;  %s2779_s28 = sshra.s32 %s2335_s4, 4  ;;  %s2780_s28 = int_to_ptr.hbm [resolvable:$true] %s2779_s28 }
  0xf0   : > { %1290 = vmatpush.msrb.mxu1 %v1275_v36  ;;  %v1345_v53 = vld [vmem:[%s4353_s6 + $0x50] sm:$0xff]  ;;  %p2786_p0 = scmp.lt.s32.totalorder %s2780_s28, %s4366_s19 }
  0xf2   : > { %1291 = vmatpush.msrb.mxu1 %v1274_v39  ;;  %v2567_v39 = vld [vmem:[%s4354_s7 + $0x150] sm:$0xf] }
  0xf3   : > { %2569 = vmatpush.msk.msrb.mxu0 %vm1150_vm1, %v2567_v39 }
  0xf5   : > { %v972_v60 = vpop.f32.mrf.mxu2  ;;  %v1001_v61 = vpop.f32.mrf.mxu3 }
  0xf6   : > { %v1070_v40 = vpop.f32.mrf.mxu0  ;;  %v1099_v41 = vpop.f32.mrf.mxu1  ;;  %v1010_v7 = vadd.f32 %v972_v60, %v903_v0  ;;  %v1011_v8 = vadd.f32 %v1001_v61, %v904_v1  ;;  %v1342_v60 = vld [vmem:[%s4353_s6 + $0x38] sm:$0xff]  ;;  %v1267_v61 = vld [vmem:[%s4396_s5 + $0x30] sm:$0xff]  ;;  %v1340_v0 = vld [vmem:[%s4353_s6 + $0x28] sm:$0xff] }
  0xf7   : > { %v1111_v21 = vadd.f32 %v1070_v40, %v1004_v11  ;;  %v1112_v22 = vadd.f32 %v1099_v41, %v1005_v12  ;;  %v1265_v1 = vld [vmem:[%s4396_s5 + $0x20] sm:$0xff]  ;;  %v1336_v11 = vld [vmem:[%s4353_s6 + $0x8] sm:$0xff] }
  0xf8   : > { %v1352_v12 = vld [vmem:[%s4353_s6 + $0x88] sm:$0xff] }
  0xf9   : > { %v1125_v32 = vadd.f32 %v1121_v13, %v1111_v21  ;;  %v1126_v33 = vadd.f32 %v1122_v14, %v1112_v22  ;;  %v1277_v22 = vld [vmem:[%s4396_s5 + $0x80] sm:$0xff] }
  0xfb   : > { %v1133_v40 = vmax.f32 %v1125_v32, 0.0  ;;  %v1134_v41 = vmax.f32 %v1126_v33, 0.0 }
  0xfe   : > { %v1073_v42 = vpop.f32.mrf.mxu0  ;;  %v1102_v43 = vpop.f32.mrf.mxu1 }
  0xff   : > { %v1113_v17 = vadd.f32 %v1073_v42, %v1006_v5  ;;  %v1114_v18 = vadd.f32 %v1102_v43, %v1007_v6  ;;  %v1141_v42 = vld [vmem:[%s4397_s18] sm:$0xff]  ;;  %v1338_v5 = vld [vmem:[%s4353_s6 + $0x18] sm:$0xff] }
 0x100   : > { %v1273_v43 = vld [vmem:[%s4396_s5 + $0x60] sm:$0xff]  ;;  %v1354_v6 = vld [vmem:[%s4353_s6 + $0x98] sm:$0xff] }
 0x101   : > { %v1127_v27 = vadd.f32 %v1121_v13, %v1113_v17  ;;  %v1128_v28 = vadd.f32 %v1122_v14, %v1114_v18  ;;  %1292 = vmatpush.msrb.mxu1 %v1273_v43  ;;  %v1280_v17 = vld [vmem:[%s4396_s5 + $0x98] sm:$0xff]  ;;  %v1279_v18 = vld [vmem:[%s4396_s5 + $0x90] sm:$0xff]  ;;  %v2565_v43 = vld [vmem:[%s4354_s7 + $0x140] sm:$0xff] }
 0x102   : > { %1472 = vmatpush.msrb.mxu0 %v2565_v43  ;;  %v2614_v43 = vld [vmem:[%s4354_s7 + $0x238] sm:$0xff] }
 0x103   : > { %v1135_v37 = vmax.f32 %v1127_v27, 0.0  ;;  %v1136_v38 = vmax.f32 %v1128_v28, 0.0  ;;  %1293 = vmatpush.msrb.mxu1 %v1272_v44  ;;  %v1422_v27 = vld [vmem:[%s4354_s7 + $0x90] sm:$0xff]  ;;  %v1423_v28 = vld [vmem:[%s4354_s7 + $0x98] sm:$0xff]  ;;  %v2566_v44 = vld [vmem:[%s4354_s7 + $0x148] sm:$0xff] }
 0x105   : > { %1294 = vmatpush.msrb.mxu1 %v1271_v45  ;;  %v1416_v45 = vld [vmem:[%s4354_s7 + $0x60] sm:$0xff] }
 0x106   : > { %v1076_v46 = vpop.f32.mrf.mxu0  ;;  %v1105_v47 = vpop.f32.mrf.mxu1 }
 0x107   : > { %v1115_v9 = vadd.f32 %v1076_v46, %v1008_v62  ;;  %v1116_v10 = vadd.f32 %v1105_v47, %v1009_v63  ;;  %v1142_v46 = vld [vmem:[%s4397_s18 + $0x8] sm:$0x3f]  ;;  %v1350_v47 = vld [vmem:[%s4353_s6 + $0x78] sm:$0xff]  ;;  %1295 = vmatpush.msrb.mxu1 %v1270_v55  ;;  %v1341_v62 = vld [vmem:[%s4353_s6 + $0x30] sm:$0xff] }
 0x108   : > { %v1266_v63 = vld [vmem:[%s4396_s5 + $0x28] sm:$0xff]  ;;  %v2559_v55 = vld [vmem:[%s4354_s7 + $0x110] sm:$0xff] }
 0x109   : > { %v1129_v23 = vadd.f32 %v1121_v13, %v1115_v9  ;;  %v1130_v24 = vadd.f32 %v1122_v14, %v1116_v10  ;;  %1296 = vmatpush.msrb.mxu1 %v1269_v57  ;;  %v1337_v9 = vld [vmem:[%s4353_s6 + $0x10] sm:$0xff]  ;;  %v1262_v10 = vld [vmem:[%s4396_s5 + $0x8] sm:$0xff] }
 0x10a   : > { %v1410_v57 = vld [vmem:[%s4354_s7 + $0x30] sm:$0xff] }
 0x10b   : > { %v1137_v34 = vmax.f32 %v1129_v23, 0.0  ;;  %v1138_v35 = vmax.f32 %v1130_v24, 0.0  ;;  %1297 = vmatpush.msrb.mxu1 %v1268_v59  ;;  %v2557_v59 = vld [vmem:[%s4354_s7 + $0x100] sm:$0xff] }
 0x10d   : > { %1298 = vmatpush.msrb.mxu1 %v1267_v61  ;;  %v1408_v61 = vld [vmem:[%s4354_s7 + $0x20] sm:$0xff] }
 0x10e   : > { %v1079_v15 = vpop.f32.mrf.mxu0  ;;  %v1108_v16 = vpop.f32.mrf.mxu1 }
 0x10f   : > { %v1117_v19 = vadd.f32 %v1079_v15, %v1010_v7  ;;  %v1118_v20 = vadd.f32 %v1108_v16, %v1011_v8  ;;  %1299 = vmatpush.msrb.mxu1 %v1266_v63  ;;  %v1353_v7 = vld [vmem:[%s4353_s6 + $0x90] sm:$0xff]  ;;  %v1351_v15 = vld [vmem:[%s4353_s6 + $0x80] sm:$0xff] }
 0x110   : > { %v1263_v8 = vld [vmem:[%s4396_s5 + $0x10] sm:$0xff]  ;;  %v1281_v16 = vld [vmem:[%s4396_s5 + $0xa0] sm:$0xff] }
 0x111   : > { %v1131_v25 = vadd.f32 %v1121_v13, %v1117_v19  ;;  %v1132_v26 = vadd.f32 %v1122_v14, %v1118_v20  ;;  %1300 = vmatpush.msrb.mxu1 %v1265_v1  ;;  %v1261_v13 = vld [vmem:[%s4396_s5] sm:$0xff]  ;;  %v1278_v19 = vld [vmem:[%s4396_s5 + $0x88] sm:$0xff]  ;;  %v2555_v63 = vld [vmem:[%s4354_s7 + $0xf0] sm:$0xff]  ;;  %s2781_s5 = scalar_lea.hbm %s2780_s28, 1 }
 0x112   : > { %v1335_v14 = vld [vmem:[%s4353_s6] sm:$0xff]  ;;  %v1406_v1 = vld [vmem:[%s4354_s7 + $0x10] sm:$0xff]  ;;  %p2782_p11 = scmp.ne.s32.totalorder %s2780_s28, %s2781_s5  ;;  %p2787_p1 = scmp.lt.s32.totalorder %s2785_s25, %s2781_s5 }
 0x113   : > { %v1139_v29 = vmax.f32 %v1131_v25, 0.0  ;;  %v1140_v30 = vmax.f32 %v1132_v26, 0.0  ;;  %1301 = vmatpush.msrb.mxu1 %v1264_v4  ;;  %v1424_v25 = vld [vmem:[%s4354_s7 + $0xa0] sm:$0xf]  ;;  %v1425_v26 = vld [vmem:[%s4354_s7 + $0xa8] sm:$0xf] }
 0x114   : > { %v2554_v4 = vld [vmem:[%s4354_s7 + $0xe8] sm:$0xff]  ;;  %p2783_p12 = pnand %p2782_p11, %p2967_p5  ;;  %p2788_p2 = por %p2787_p1, %p2786_p0 }
 0x115   : > { %2531 = vmatpush.msk.msra.mxu2 %vm1150_vm1, %v1139_v29  ;;  %2534 = vmatpush.msk.msra.mxu3 %vm1150_vm1, %v1140_v30 }
 0x116   : > { %1302 = vmatpush.msrb.mxu1 %v1263_v8  ;;  %v2630_v8 = vld [vmem:[%s4354_s7 + $0x2b8] sm:$0xf]  ;;  %p2784_p13 = pneg %p2783_p12 }
 0x117   : > { %1170 = vmatpush.msra.mxu2 %v1137_v34  ;;  %1193 = vmatpush.msra.mxu3 %v1138_v35 }
 0x118   : > { %1303 = vmatpush.msrb.mxu1 %v1262_v10  ;;  %v2552_v10 = vld [vmem:[%s4354_s7 + $0xd8] sm:$0xff]  ;;  %p2789_p3 = pnand %p2788_p2, %p2784_p13 }
 0x119   : > { %1171 = vmatpush.msra.mxu2 %v1135_v37  ;;  %1194 = vmatpush.msra.mxu3 %v1136_v38 }
 0x11a   : > { %1304 = vmatpush.msrb.mxu1 %v1261_v13  ;;  %v2549_v13 = vld [vmem:[%s4354_s7 + $0xc0] sm:$0xff] }
 0x11b   : > { %1172 = vmatpush.msra.mxu2 %v1133_v40  ;;  %1195 = vmatpush.msra.mxu3 %v1134_v41 }
 0x11c   : > { %2532 = vmatmul.msk.f32.vlgmr.msra.gmra.mxu2 %vm1143_vm2, %v1141_v42  ;;  %2535 = vmatmul.msk.f32.vlgmr.msra.gmra.mxu3 %vm1143_vm2, %v1141_v42  ;;  %v1419_v42 = vld [vmem:[%s4354_s7 + $0x78] sm:$0xff] }
 0x11d   : > { %2537 = vmatpush.msk.msrb.mxu2 %vm1150_vm1, %v1139_v29  ;;  %2540 = vmatpush.msk.msrb.mxu3 %vm1150_vm1, %v1140_v30  ;;  %v1420_v29 = vld [vmem:[%s4354_s7 + $0x80] sm:$0xff]  ;;  %v1421_v30 = vld [vmem:[%s4354_s7 + $0x88] sm:$0xff] }
 0x11e   : > { %1323 = vmatpush.msra.mxu1 %v1281_v16  ;;  %v2626_v16 = vld [vmem:[%s4354_s7 + $0x298] sm:$0xff] }
 0x11f   : > { %1224 = vmatpush.msrb.mxu2 %v1137_v34  ;;  %1247 = vmatpush.msrb.mxu3 %v1138_v35 }
 0x120   : > { %1324 = vmatpush.msra.mxu1 %v1280_v17  ;;  %v2547_v17 = vld [vmem:[%s4354_s7 + $0xb0] sm:$0xff] }
 0x121   : > { %1225 = vmatpush.msrb.mxu2 %v1135_v37  ;;  %1248 = vmatpush.msrb.mxu3 %v1136_v38 }
 0x122   : > { %1325 = vmatpush.msra.mxu1 %v1279_v18  ;;  %v2548_v18 = vld [vmem:[%s4354_s7 + $0xb8] sm:$0xff] }
 0x123   : > { %1226 = vmatpush.msrb.mxu2 %v1133_v40  ;;  %1249 = vmatpush.msrb.mxu3 %v1134_v41  ;;  %v2568_v40 = vld [vmem:[%s4354_s7 + $0x158] sm:$0xf]  ;;  %v1418_v41 = vld [vmem:[%s4354_s7 + $0x70] sm:$0xff] }
 0x124   : > { %2533 = vmatmul.msk.f32.gmra.mxu2 %vm1143_vm2, %v1142_v46  ;;  %2536 = vmatmul.msk.f32.gmra.mxu3 %vm1143_vm2, %v1142_v46  ;;  %v1417_v46 = vld [vmem:[%s4354_s7 + $0x68] sm:$0xff] }
 0x125   : > { %1356 = vmatpush.msra.mxu2 %v1350_v47  ;;  %1390 = vmatpush.msra.mxu3 %v1355_v3  ;;  %v2563_v47 = vld [vmem:[%s4354_s7 + $0x130] sm:$0xff]  ;;  %v2553_v3 = vld [vmem:[%s4354_s7 + $0xe0] sm:$0xff] }
 0x126   : > { %1326 = vmatpush.msra.mxu1 %v1278_v19  ;;  %1473 = vmatpush.msrb.mxu0 %v2563_v47  ;;  %v2601_v19 = vld [vmem:[%s4354_s7 + $0x200] sm:$0xf]  ;;  %v2612_v47 = vld [vmem:[%s4354_s7 + $0x228] sm:$0xff] }
 0x127   : > { %1357 = vmatpush.msra.mxu2 %v1349_v48  ;;  %1391 = vmatpush.msra.mxu3 %v1354_v6  ;;  %v2564_v48 = vld [vmem:[%s4354_s7 + $0x138] sm:$0xff]  ;;  %v1405_v6 = vld [vmem:[%s4354_s7 + $0x8] sm:$0xff] }
 0x128   : > { %1327 = vmatpush.msra.mxu1 %v1277_v22  ;;  %v2624_v22 = vld [vmem:[%s4354_s7 + $0x288] sm:$0xff] }
 0x129   : > { %1358 = vmatpush.msra.mxu2 %v1348_v49  ;;  %1392 = vmatpush.msra.mxu3 %v1353_v7  ;;  %v1414_v49 = vld [vmem:[%s4354_s7 + $0x50] sm:$0xff] }
 0x12a   : > { %v2629_v7 = vld [vmem:[%s4354_s7 + $0x2b0] sm:$0xf] }
 0x12b   : > { %1359 = vmatpush.msra.mxu2 %v1347_v50  ;;  %1393 = vmatpush.msra.mxu3 %v1352_v12  ;;  %v1415_v50 = vld [vmem:[%s4354_s7 + $0x58] sm:$0xff]  ;;  %v2628_v12 = vld [vmem:[%s4354_s7 + $0x2a8] sm:$0xff] }
 0x12c   : > { %2538 = vmatmul.msk.f32.vlgmr.msrb.gmra.mxu2 %vm1143_vm2, %v1203_v51  ;;  %2541 = vmatmul.msk.f32.vlgmr.msrb.gmra.mxu3 %vm1143_vm2, %v1203_v51  ;;  %v2561_v51 = vld [vmem:[%s4354_s7 + $0x120] sm:$0xff] }
 0x12d   : > { %1360 = vmatpush.msra.mxu2 %v1346_v52  ;;  %1394 = vmatpush.msra.mxu3 %v1351_v15  ;;  %v2562_v52 = vld [vmem:[%s4354_s7 + $0x128] sm:$0xff]  ;;  %v2625_v15 = vld [vmem:[%s4354_s7 + $0x290] sm:$0xff] }
 0x12e   : > { %1474 = vmatpush.msrb.mxu0 %v2561_v51  ;;  %v2610_v51 = vld [vmem:[%s4354_s7 + $0x218] sm:$0xff] }
 0x12f   : > { %1361 = vmatpush.msra.mxu2 %v1345_v53  ;;  %2575 = vmatpush.msk.msrb.mxu3 %vm1150_vm1, %v1424_v25  ;;  %v1412_v53 = vld [vmem:[%s4354_s7 + $0x40] sm:$0xff]  ;;  %v2621_v25 = vld [vmem:[%s4354_s7 + $0x270] sm:$0xff] }
 0x130   : > { %1475 = vmatpush.msrb.mxu0 %v2559_v55  ;;  %v2583_v55 = vld [vmem:[%s4354_s7 + $0x170] sm:$0xff] }
 0x131   : > { %1362 = vmatpush.msra.mxu2 %v1344_v56  ;;  %1528 = vmatpush.msrb.mxu3 %v1422_v27  ;;  %v2560_v56 = vld [vmem:[%s4354_s7 + $0x118] sm:$0xff]  ;;  %v2597_v27 = vld [vmem:[%s4354_s7 + $0x1e0] sm:$0xff] }
 0x132   : > { %1476 = vmatpush.msrb.mxu0 %v2557_v59 }
 0x133   : > { %1363 = vmatpush.msra.mxu2 %v1343_v58  ;;  %1529 = vmatpush.msrb.mxu3 %v1420_v29  ;;  %v1411_v58 = vld [vmem:[%s4354_s7 + $0x38] sm:$0xff]  ;;  %v2619_v29 = vld [vmem:[%s4354_s7 + $0x260] sm:$0xff] }
 0x134   : > { %2539 = vmatmul.msk.f32.gmra.mxu2 %vm1143_vm2, %v1204_v54  ;;  %2542 = vmatmul.msk.f32.gmra.mxu3 %vm1143_vm2, %v1204_v54  ;;  %v1413_v54 = vld [vmem:[%s4354_s7 + $0x48] sm:$0xff] }
 0x135   : > { %1364 = vmatpush.msra.mxu2 %v1342_v60  ;;  %1530 = vmatpush.msrb.mxu3 %v1418_v41  ;;  %v2558_v60 = vld [vmem:[%s4354_s7 + $0x108] sm:$0xff]  ;;  %v2592_v41 = vld [vmem:[%s4354_s7 + $0x1b8] sm:$0xff] }
 0x136   : > { %1477 = vmatpush.msrb.mxu0 %v2555_v63 }
 0x137   : > { %1365 = vmatpush.msra.mxu2 %v1341_v62  ;;  %1531 = vmatpush.msrb.mxu3 %v1416_v45  ;;  %v1409_v62 = vld [vmem:[%s4354_s7 + $0x28] sm:$0xff] }
 0x138   : > { %1478 = vmatpush.msrb.mxu0 %v2553_v3  ;;  %v2590_v45 = vld [vmem:[%s4354_s7 + $0x1a8] sm:$0xff] }
 0x139   : > { %1366 = vmatpush.msra.mxu2 %v1340_v0  ;;  %1532 = vmatpush.msrb.mxu3 %v1414_v49  ;;  %v2556_v0 = vld [vmem:[%s4354_s7 + $0xf8] sm:$0xff] }
 0x13a   : > { %v2588_v49 = vld [vmem:[%s4354_s7 + $0x198] sm:$0xff] }
 0x13b   : > { %1367 = vmatpush.msra.mxu2 %v1339_v2  ;;  %1533 = vmatpush.msrb.mxu3 %v1412_v53  ;;  %v1407_v2 = vld [vmem:[%s4354_s7 + $0x18] sm:$0xff]  ;;  %v2586_v53 = vld [vmem:[%s4354_s7 + $0x188] sm:$0xff] }
 0x13d   : > { %1368 = vmatpush.msra.mxu2 %v1338_v5  ;;  %1534 = vmatpush.msrb.mxu3 %v1410_v57  ;;  %v1404_v5 = vld [vmem:[%s4354_s7] sm:$0xff] }
 0x13e   : > { %v2581_v57 = vld [vmem:[%s4354_s7 + $0x160] sm:$0xff] }
 0x13f   : > { %1369 = vmatpush.msra.mxu2 %v1337_v9  ;;  %1535 = vmatpush.msrb.mxu3 %v1408_v61  ;;  %v2551_v9 = vld [vmem:[%s4354_s7 + $0xd0] sm:$0xff] }
 0x140   : > { %1479 = vmatpush.msrb.mxu0 %v2551_v9  ;;  %v2657_v9 = vld [vmem:[%s4354_s7 + $0x360] sm:$0xf] }
 0x141   : > { %1370 = vmatpush.msra.mxu2 %v1336_v11  ;;  %1536 = vmatpush.msrb.mxu3 %v1406_v1  ;;  %v2627_v11 = vld [vmem:[%s4354_s7 + $0x2a0] sm:$0xff] }
 0x142   : > { %1480 = vmatpush.msrb.mxu0 %v2549_v13  ;;  %v2655_v13 = vld [vmem:[%s4354_s7 + $0x350] sm:$0xff] }
 0x143   : > { %1371 = vmatpush.msra.mxu2 %v1335_v14  ;;  %1537 = vmatpush.msrb.mxu3 %v1404_v5  ;;  %v2550_v14 = vld [vmem:[%s4354_s7 + $0xc8] sm:$0xff] }
 0x144   : > { %1481 = vmatpush.msrb.mxu0 %v2547_v17  ;;  %v2654_v17 = vld [vmem:[%s4354_s7 + $0x348] sm:$0xff] }
 0x145   : > { %2578 = vmatpush.msk.msrb.mxu2 %vm1150_vm1, %v1425_v26  ;;  %v2622_v26 = vld [vmem:[%s4354_s7 + $0x278] sm:$0xff] }
 0x146   : > { %2603 = vmatpush.msk.msra.mxu0 %vm1150_vm1, %v2601_v19  ;;  %v2651_v19 = vld [vmem:[%s4354_s7 + $0x330] sm:$0xff] }
 0x147   : > { %1551 = vmatpush.msrb.mxu2 %v1423_v28  ;;  %v2598_v28 = vld [vmem:[%s4354_s7 + $0x1e8] sm:$0xff] }
 0x149   : > { %1552 = vmatpush.msrb.mxu2 %v1421_v30  ;;  %v2620_v30 = vld [vmem:[%s4354_s7 + $0x268] sm:$0xff] }
 0x14b   : > { %1553 = vmatpush.msrb.mxu2 %v1419_v42  ;;  %v2613_v42 = vld [vmem:[%s4354_s7 + $0x230] sm:$0xff] }
 0x14d   : > { %1554 = vmatpush.msrb.mxu2 %v1417_v46  ;;  %v2611_v46 = vld [vmem:[%s4354_s7 + $0x220] sm:$0xff] }
 0x14f   : > { %1555 = vmatpush.msrb.mxu2 %v1415_v50  ;;  %v2609_v50 = vld [vmem:[%s4354_s7 + $0x210] sm:$0xff] }
 0x151   : > { %1556 = vmatpush.msrb.mxu2 %v1413_v54 }
 0x153   : > { %1557 = vmatpush.msrb.mxu2 %v1411_v58  ;;  %v2582_v58 = vld [vmem:[%s4354_s7 + $0x168] sm:$0xff] }
 0x155   : > { %1558 = vmatpush.msrb.mxu2 %v1409_v62 }
 0x157   : > { %1559 = vmatpush.msrb.mxu2 %v1407_v2 }
 0x159   : > { %1560 = vmatpush.msrb.mxu2 %v1405_v6 }
 0x19f   : > { %v1174_v20 = vpop.f32.mrf.mxu2  ;;  %v1197_v21 = vpop.f32.mrf.mxu3 }
 0x1a7   : > { %v1177_v23 = vpop.f32.mrf.mxu2  ;;  %v1200_v24 = vpop.f32.mrf.mxu3 }
 0x1af   : > { %v1228_v31 = vpop.f32.mrf.mxu2  ;;  %v1251_v32 = vpop.f32.mrf.mxu3 }
 0x1b0   : > { %v1257_v33 = vmax.f32 %v1174_v20, %v1228_v31  ;;  %v1258_v34 = vmax.f32 %v1197_v21, %v1251_v32  ;;  %v2602_v20 = vld [vmem:[%s4354_s7 + $0x208] sm:$0xf]  ;;  %v2623_v21 = vld [vmem:[%s4354_s7 + $0x280] sm:$0xff]  ;;  %v2595_v31 = vld [vmem:[%s4354_s7 + $0x1d0] sm:$0xff] }
 0x1b1   : > { %v2596_v32 = vld [vmem:[%s4354_s7 + $0x1d8] sm:$0xff] }
 0x1b2   : > { %1305 = vmatmul.f32.vlgmr.msrb.gmra.mxu1 %v1257_v33  ;;  %1372 = vmatmul.f32.vlgmr.msra.gmra.mxu2 %v1257_v33  ;;  %v2617_v33 = vld [vmem:[%s4354_s7 + $0x250] sm:$0xff] }
 0x1b3   : > { %2545 = vmatmul.msk.f32.vlgmr.msra.gmra.mxu3 %vm1282_vm3, %v1258_v34  ;;  %2572 = vmatpush.msk.msrb.mxu1 %vm1150_vm1, %v2568_v40  ;;  %v2591_v40 = vld [vmem:[%s4354_s7 + $0x1b0] sm:$0xff] }
 0x1b4   : > { %2631 = vmatpush.msk.msra.mxu3 %vm1150_vm1, %v2629_v7  ;;  %2634 = vmatpush.msk.msra.mxu2 %vm1150_vm1, %v2630_v8 }
 0x1b5   : > { %1495 = vmatpush.msrb.mxu1 %v2566_v44  ;;  %v2589_v44 = vld [vmem:[%s4354_s7 + $0x1a0] sm:$0xff] }
 0x1b6   : > { %1698 = vmatpush.msra.mxu3 %v2627_v11  ;;  %1721 = vmatpush.msra.mxu2 %v2628_v12 }
 0x1b7   : > { %v1231_v35 = vpop.f32.mrf.mxu2  ;;  %v1254_v36 = vpop.f32.mrf.mxu3  ;;  %1496 = vmatpush.msrb.mxu1 %v2564_v48  ;;  %v2587_v48 = vld [vmem:[%s4354_s7 + $0x190] sm:$0xff] }
 0x1b8   : > { %v1259_v37 = vmax.f32 %v1177_v23, %v1231_v35  ;;  %v1260_v38 = vmax.f32 %v1200_v24, %v1254_v36  ;;  %1699 = vmatpush.msra.mxu3 %v2625_v15  ;;  %1722 = vmatpush.msra.mxu2 %v2626_v16  ;;  %v2599_v23 = vld [vmem:[%s4354_s7 + $0x1f0] sm:$0xff]  ;;  %v2600_v24 = vld [vmem:[%s4354_s7 + $0x1f8] sm:$0xff]  ;;  %v2593_v35 = vld [vmem:[%s4354_s7 + $0x1c0] sm:$0xff] }
 0x1b9   : > { %1497 = vmatpush.msrb.mxu1 %v2562_v52  ;;  %1611 = vmatpush.msra.mxu0 %v2599_v23  ;;  %v2594_v36 = vld [vmem:[%s4354_s7 + $0x1c8] sm:$0xff]  ;;  %v2585_v52 = vld [vmem:[%s4354_s7 + $0x180] sm:$0xff] }
 0x1ba   : > { %1308 = vmatmul.f32.gmra.mxu1 %v1259_v37  ;;  %1375 = vmatmul.f32.gmra.mxu2 %v1259_v37  ;;  %v2615_v37 = vld [vmem:[%s4354_s7 + $0x240] sm:$0xff] }
 0x1bb   : > { %2546 = vmatmul.msk.f32.gmra.mxu3 %vm1282_vm3, %v1260_v38  ;;  %1498 = vmatpush.msrb.mxu1 %v2560_v56  ;;  %v2584_v56 = vld [vmem:[%s4354_s7 + $0x178] sm:$0xff]  ;;  %v2653_v16 = vld [vmem:[%s4354_s7 + $0x340] sm:$0xff] }
 0x1bc   : > { %1700 = vmatpush.msra.mxu3 %v2623_v21  ;;  %1723 = vmatpush.msra.mxu2 %v2624_v22  ;;  %v2649_v21 = vld [vmem:[%s4354_s7 + $0x320] sm:$0xff]  ;;  %v2650_v22 = vld [vmem:[%s4354_s7 + $0x328] sm:$0xff] }
 0x1bd   : > { %1499 = vmatpush.msrb.mxu1 %v2558_v60  ;;  %1612 = vmatpush.msra.mxu0 %v2597_v27  ;;  %v2645_v27 = vld [vmem:[%s4354_s7 + $0x300] sm:$0xff] }
 0x1be   : > { %1701 = vmatpush.msra.mxu3 %v2621_v25  ;;  %1724 = vmatpush.msra.mxu2 %v2622_v26  ;;  %v2648_v25 = vld [vmem:[%s4354_s7 + $0x318] sm:$0xff] }
 0x1bf   : > { %1500 = vmatpush.msrb.mxu1 %v2556_v0  ;;  %1613 = vmatpush.msra.mxu0 %v2595_v31  ;;  %v2644_v31 = vld [vmem:[%s4354_s7 + $0x2f8] sm:$0xff] }
 0x1c0   : > { %1702 = vmatpush.msra.mxu3 %v2619_v29  ;;  %1725 = vmatpush.msra.mxu2 %v2620_v30  ;;  %v2643_v30 = vld [vmem:[%s4354_s7 + $0x2f0] sm:$0xff] }
 0x1c1   : > { %1501 = vmatpush.msrb.mxu1 %v2554_v4  ;;  %1614 = vmatpush.msra.mxu0 %v2593_v35  ;;  %v2640_v35 = vld [vmem:[%s4354_s7 + $0x2d8] sm:$0xff] }
 0x1c2   : > { %2543 = vmatmul.msk.f32.vlgmr.msra.gmra.mxu1 %vm1282_vm3, %v1258_v34  ;;  %v2618_v34 = vld [vmem:[%s4354_s7 + $0x258] sm:$0xff]  ;;  %1703 = vmatpush.msra.mxu3 %v2617_v33  ;;  %v2642_v33 = vld [vmem:[%s4354_s7 + $0x2e8] sm:$0xff] }
 0x1c3   : > { %1502 = vmatpush.msrb.mxu1 %v2552_v10  ;;  %1726 = vmatpush.msra.mxu2 %v2618_v34  ;;  %v2658_v10 = vld [vmem:[%s4354_s7 + $0x368] sm:$0xf]  ;;  %v2639_v34 = vld [vmem:[%s4354_s7 + $0x2d0] sm:$0xff] }
 0x1c4   : > { %1704 = vmatpush.msra.mxu3 %v2615_v37  ;;  %1615 = vmatpush.msra.mxu0 %v2591_v40  ;;  %v2638_v37 = vld [vmem:[%s4354_s7 + $0x2c8] sm:$0xff] }
 0x1c5   : > { %1503 = vmatpush.msrb.mxu1 %v2550_v14  ;;  %v2656_v14 = vld [vmem:[%s4354_s7 + $0x358] sm:$0xff] }
 0x1c6   : > { %1705 = vmatpush.msra.mxu3 %v2613_v42  ;;  %1616 = vmatpush.msra.mxu0 %v2589_v44 }
 0x1c7   : > { %1504 = vmatpush.msrb.mxu1 %v2548_v18 }
 0x1c8   : > { %1706 = vmatpush.msra.mxu3 %v2611_v46  ;;  %1617 = vmatpush.msra.mxu0 %v2587_v48 }
 0x1c9   : > { %2606 = vmatpush.msk.msra.mxu1 %vm1150_vm1, %v2602_v20  ;;  %v2652_v20 = vld [vmem:[%s4354_s7 + $0x338] sm:$0xff] }
 0x1ca   : > { %2544 = vmatmul.msk.f32.gmra.mxu1 %vm1282_vm3, %v1260_v38  ;;  %v2616_v38 = vld [vmem:[%s4354_s7 + $0x248] sm:$0xff]  ;;  %1707 = vmatpush.msra.mxu3 %v2609_v50 }
 0x1cb   : > { %1634 = vmatpush.msra.mxu1 %v2600_v24  ;;  %1727 = vmatpush.msra.mxu2 %v2616_v38  ;;  %v2647_v24 = vld [vmem:[%s4354_s7 + $0x310] sm:$0xff] }
 0x1cc   : > { %1618 = vmatpush.msra.mxu0 %v2585_v52 }
 0x1cd   : > { %1635 = vmatpush.msra.mxu1 %v2598_v28  ;;  %1728 = vmatpush.msra.mxu2 %v2614_v43  ;;  %v2646_v28 = vld [vmem:[%s4354_s7 + $0x308] sm:$0xff] }
 0x1ce   : > { %1619 = vmatpush.msra.mxu0 %v2583_v55 }
 0x1cf   : > { %1636 = vmatpush.msra.mxu1 %v2596_v32  ;;  %1729 = vmatpush.msra.mxu2 %v2612_v47  ;;  %v2641_v32 = vld [vmem:[%s4354_s7 + $0x2e0] sm:$0xff] }
 0x1d0   : > { %1620 = vmatpush.msra.mxu0 %v2581_v57 }
 0x1d1   : > { %1637 = vmatpush.msra.mxu1 %v2594_v36  ;;  %1730 = vmatpush.msra.mxu2 %v2610_v51  ;;  %v2637_v36 = vld [vmem:[%s4354_s7 + $0x2c0] sm:$0xff] }
 0x1d3   : > { %1638 = vmatpush.msra.mxu1 %v2592_v41 }
 0x1d5   : > { %1639 = vmatpush.msra.mxu1 %v2590_v45 }
 0x1d7   : > { %1640 = vmatpush.msra.mxu1 %v2588_v49 }
 0x1d9   : > { %1641 = vmatpush.msra.mxu1 %v2586_v53 }
 0x1db   : > { %1642 = vmatpush.msra.mxu1 %v2584_v56 }
 0x1dd   : > { %1643 = vmatpush.msra.mxu1 %v2582_v58 }
 0x22f   : > { %v1306_v39 = vpop.f32.mrf.mxu1 }
 0x235   : > { %v1373_v59 = vpop.f32.mrf.mxu2 }
 0x236   : > { %v1396_v60 = vpop.f32.mrf.mxu3 }
 0x237   : > { %v1309_v54 = vpop.f32.mrf.mxu1  ;;  %v1397_v62 = vadd.f32 %v1396_v60, %v1373_v59 }
 0x23d   : > { %v1376_v1 = vpop.f32.mrf.mxu2 }
 0x23e   : > { %v1399_v2 = vpop.f32.mrf.mxu3 }
 0x23f   : > { %v1329_v61 = vpop.f32.mrf.mxu1  ;;  %v1400_v4 = vadd.f32 %v1399_v2, %v1376_v1  ;;  %v1828_v2 = vld [vmem:[%s4355_s8] sm:$0x3] }
 0x240   : > { %v1330_v63 = vadd.f32 %v1329_v61, %v1306_v39  ;;  %v1955_v61 = vld [vmem:[%s4358_s11 + $0x78] sm:$0xff] }
 0x242   : > { %v3834_v0 = vmax.f32 %v1330_v63, %v1397_v62  ;;  %v1954_v62 = vld [vmem:[%s4358_s11 + $0x70] sm:$0xff] }
 0x244   : > { %2576 = vmatmul.msk.f32.vlgmr.msrb.gmra.mxu3 %vm1455_vm4, %v3834_v0  ;;  %2579 = vmatmul.msk.f32.vlgmr.msrb.gmra.mxu2 %vm1455_vm4, %v3834_v0  ;;  %v1452_v7 = vrot.slane %v3834_v0, 1  ;;  %v1679_v15 = vrot.slane %v3834_v0, 3  ;;  %v1592_v26 = vrot.slane %v3834_v0, 2  ;;  %v1765_v39 = vrot.slane %v3834_v0, 4 }
 0x247   : > { %v1332_v3 = vpop.f32.mrf.mxu1 }
 0x248   : > { %v1333_v5 = vadd.f32 %v1332_v3, %v1309_v54  ;;  %v1953_v3 = vld [vmem:[%s4358_s11 + $0x68] sm:$0xff] }
 0x24a   : > { %v3840_v6 = vmax.f32 %v1333_v5, %v1400_v4 }
 0x24c   : > { %2577 = vmatmul.msk.f32.gmra.mxu3 %vm1455_vm4, %v3840_v6  ;;  %2580 = vmatmul.msk.f32.gmra.mxu2 %vm1455_vm4, %v3840_v6  ;;  %v1453_v8 = vrot.slane %v3840_v6, 1  ;;  %v1680_v12 = vrot.slane %v3840_v6, 3  ;;  %v1593_v23 = vrot.slane %v3840_v6, 2  ;;  %v1766_v38 = vrot.slane %v3840_v6, 4 }
 0x24e   : > { %v1454_v11 = vsel %vm1451_vm5, %v1452_v7, %v1453_v8  ;;  %v1681_v18 = vsel %vm1678_vm6, %v1679_v15, %v1680_v12  ;;  %v1594_v29 = vsel %vm1591_vm7, %v1592_v26, %v1593_v23  ;;  %v1767_v40 = vsel %vm1150_vm1, %v1765_v39, %v1766_v38  ;;  %v1951_v15 = vld [vmem:[%s4358_s11 + $0x58] sm:$0xff]  ;;  %v1949_v26 = vld [vmem:[%s4358_s11 + $0x48] sm:$0xff] }
 0x24f   : > { %2570 = vmatmul.msk.f32.vlgmr.msrb.gmra.mxu0 %vm1455_vm4, %v1454_v11  ;;  %2573 = vmatmul.msk.f32.vlgmr.msrb.gmra.mxu1 %vm1455_vm4, %v1454_v11  ;;  %v2013_v39 = vld [vmem:[%s4359_s12 + $0x48] sm:$0xff] }
 0x250   : > { %2659 = vmatpush.msk.msrb.mxu0 %vm1150_vm1, %v2657_v9  ;;  %2662 = vmatpush.msk.msrb.mxu1 %vm1150_vm1, %v2658_v10  ;;  %v1830_v10 = vperm.slane %v1828_v2, 0 }
 0x252   : > { %1784 = vmatpush.msrb.mxu0 %v2655_v13  ;;  %1807 = vmatpush.msrb.mxu1 %v2656_v14 }
 0x254   : > { %2632 = vmatmul.msk.f32.vlgmr.msra.gmra.mxu3 %vm1455_vm4, %v1681_v18  ;;  %2635 = vmatmul.msk.f32.vlgmr.msra.gmra.mxu2 %vm1455_vm4, %v1681_v18 }
 0x255   : > { %1785 = vmatpush.msrb.mxu0 %v2653_v16  ;;  %1808 = vmatpush.msrb.mxu1 %v2654_v17 }
 0x257   : > { %2571 = vmatmul.msk.f32.gmra.mxu0 %vm1455_vm4, %v1453_v8  ;;  %2574 = vmatmul.msk.f32.gmra.mxu1 %vm1455_vm4, %v1453_v8  ;;  %v1952_v8 = vld [vmem:[%s4358_s11 + $0x60] sm:$0xff] }
 0x258   : > { %1786 = vmatpush.msrb.mxu0 %v2651_v19  ;;  %1809 = vmatpush.msrb.mxu1 %v2652_v20  ;;  %v1950_v19 = vld [vmem:[%s4358_s11 + $0x50] sm:$0xff] }
 0x25a   : > { %1787 = vmatpush.msrb.mxu0 %v2649_v21  ;;  %1810 = vmatpush.msrb.mxu1 %v2650_v22  ;;  %v1831_v22 = vperm.slane %v1828_v2, 1  ;;  %v2074_v2 = vld [vmem:[%s4360_s13 + $0x48] sm:$0xff] }
 0x25c   : > { %2633 = vmatmul.msk.f32.gmra.mxu3 %vm1455_vm4, %v1680_v12  ;;  %2636 = vmatmul.msk.f32.gmra.mxu2 %vm1455_vm4, %v1680_v12 }
 0x25d   : > { %1788 = vmatpush.msrb.mxu0 %v2647_v24  ;;  %1811 = vmatpush.msrb.mxu1 %v2648_v25 }
 0x25f   : > { %2604 = vmatmul.msk.f32.vlgmr.msra.gmra.mxu0 %vm1455_vm4, %v1594_v29  ;;  %2607 = vmatmul.msk.f32.vlgmr.msra.gmra.mxu1 %vm1455_vm4, %v1594_v29  ;;  %v1842_v29 = vld [vmem:[%s4356_s9] sm:$0x1f] }
 0x260   : > { %1789 = vmatpush.msrb.mxu0 %v2645_v27  ;;  %1812 = vmatpush.msrb.mxu1 %v2646_v28 }
 0x262   : > { %1790 = vmatpush.msrb.mxu0 %v2643_v30  ;;  %1813 = vmatpush.msrb.mxu1 %v2644_v31  ;;  %v1894_v30 = vld [vmem:[%s4357_s10] sm:$0x1f]  ;;  %v2019_v31 = vld [vmem:[%s4359_s12 + $0x78] sm:$0xff] }
 0x264   : > { %1791 = vmatpush.msrb.mxu0 %v2641_v32  ;;  %1814 = vmatpush.msrb.mxu1 %v2642_v33  ;;  %v2018_v33 = vld [vmem:[%s4359_s12 + $0x70] sm:$0xff] }
 0x266   : > { %1792 = vmatpush.msrb.mxu0 %v2639_v34  ;;  %1815 = vmatpush.msrb.mxu1 %v2640_v35  ;;  %v2017_v35 = vld [vmem:[%s4359_s12 + $0x68] sm:$0xff] }
 0x267   : > { %2605 = vmatmul.msk.f32.gmra.mxu0 %vm1455_vm4, %v1593_v23  ;;  %2608 = vmatmul.msk.f32.gmra.mxu1 %vm1455_vm4, %v1593_v23 }
 0x268   : > { %1793 = vmatpush.msrb.mxu0 %v2637_v36  ;;  %1816 = vmatpush.msrb.mxu1 %v2638_v37  ;;  %v2016_v36 = vld [vmem:[%s4359_s12 + $0x60] sm:$0xff]  ;;  %v2015_v37 = vld [vmem:[%s4359_s12 + $0x58] sm:$0xff] }
 0x26a   : > { %1964 = vmatpush.msra.mxu0 %v1955_v61  ;;  %v1958_v61 = vld [vmem:[%s4358_s11 + $0x90] sm:$0xff] }
 0x26c   : > { %1965 = vmatpush.msra.mxu0 %v1954_v62  ;;  %v2021_v62 = vld [vmem:[%s4359_s12 + $0x88] sm:$0xff] }
 0x26e   : > { %1966 = vmatpush.msra.mxu0 %v1953_v3  ;;  %v2684_v3 = vld [vmem:[%s4360_s13 + $0x98] sm:$0xff] }
 0x26f   : > { %2660 = vmatmul.msk.f32.vlgmr.msrb.gmra.mxu0 %vm1455_vm4, %v1767_v40  ;;  %2663 = vmatmul.msk.f32.vlgmr.msrb.gmra.mxu1 %vm1455_vm4, %v1767_v40  ;;  %v1948_v40 = vld [vmem:[%s4358_s11 + $0x40] sm:$0xff] }
 0x270   : > { %1967 = vmatpush.msra.mxu0 %v1952_v8  ;;  %2097 = vmatpush.msra.mxu1 %v2684_v3  ;;  %v2071_v8 = vld [vmem:[%s4360_s13 + $0x30] sm:$0xff] }
 0x272   : > { %1968 = vmatpush.msra.mxu0 %v1951_v15  ;;  %v2678_v15 = vld [vmem:[%s4360_s13 + $0x68] sm:$0xff] }
 0x274   : > { %1969 = vmatpush.msra.mxu0 %v1950_v19 }
 0x276   : > { %1970 = vmatpush.msra.mxu0 %v1949_v26  ;;  %v2676_v26 = vld [vmem:[%s4360_s13 + $0x58] sm:$0xff] }
 0x277   : > { %2661 = vmatmul.msk.f32.gmra.mxu0 %vm1455_vm4, %v1766_v38  ;;  %2664 = vmatmul.msk.f32.gmra.mxu1 %vm1455_vm4, %v1766_v38  ;;  %v2014_v38 = vld [vmem:[%s4359_s12 + $0x50] sm:$0xff] }
 0x278   : > { %1971 = vmatpush.msra.mxu0 %v1948_v40  ;;  %v2715_v40 = vld [vmem:[%s4360_s13 + $0x170] sm:$0xff] }
 0x2c7   : > { %v1539_v43 = vpop.f32.mrf.mxu3  ;;  %v1562_v44 = vpop.f32.mrf.mxu2 }
 0x2cc   : > { %v1483_v41 = vpop.f32.mrf.mxu0  ;;  %v1506_v42 = vpop.f32.mrf.mxu1 }
 0x2cd   : > { %v1540_v55 = vadd.f32 %v1539_v43, %v1483_v41  ;;  %v1563_v63 = vadd.f32 %v1562_v44, %v1506_v42  ;;  %v2012_v41 = vld [vmem:[%s4359_s12 + $0x40] sm:$0xff]  ;;  %v1947_v42 = vld [vmem:[%s4358_s11 + $0x38] sm:$0xff]  ;;  %v1946_v44 = vld [vmem:[%s4358_s11 + $0x30] sm:$0xff] }
 0x2ce   : > { %v2011_v43 = vld [vmem:[%s4359_s12 + $0x38] sm:$0xff]  ;;  %1972 = vmatpush.msra.mxu0 %v1947_v42  ;;  %v2704_v42 = vld [vmem:[%s4360_s13 + $0x120] sm:$0xff] }
 0x2cf   : > { %v1542_v49 = vpop.f32.mrf.mxu3  ;;  %v1565_v50 = vpop.f32.mrf.mxu2 }
 0x2d0   : > { %1973 = vmatpush.msra.mxu0 %v1946_v44  ;;  %v2689_v44 = vld [vmem:[%s4360_s13 + $0xb0] sm:$0xff] }
 0x2d4   : > { %v1486_v45 = vpop.f32.mrf.mxu0  ;;  %v1509_v46 = vpop.f32.mrf.mxu1 }
 0x2d5   : > { %v1543_v58 = vadd.f32 %v1542_v49, %v1486_v45  ;;  %v1566_v59 = vadd.f32 %v1565_v50, %v1509_v46  ;;  %v2010_v45 = vld [vmem:[%s4359_s12 + $0x30] sm:$0xff]  ;;  %v1945_v46 = vld [vmem:[%s4358_s11 + $0x28] sm:$0xff]  ;;  %v2008_v49 = vld [vmem:[%s4359_s12 + $0x20] sm:$0xff] }
 0x2d6   : > { %1974 = vmatpush.msra.mxu0 %v1945_v46  ;;  %v1943_v50 = vld [vmem:[%s4358_s11 + $0x18] sm:$0xff]  ;;  %v2713_v46 = vld [vmem:[%s4360_s13 + $0x160] sm:$0xff] }
 0x2d7   : > { %v1709_v53 = vpop.f32.mrf.mxu3  ;;  %v1732_v54 = vpop.f32.mrf.mxu2 }
 0x2dc   : > { %v1622_v47 = vpop.f32.mrf.mxu0  ;;  %v1645_v48 = vpop.f32.mrf.mxu1 }
 0x2dd   : > { %v1651_v60 = vadd.f32 %v1622_v47, %v1540_v55  ;;  %v1652_v4 = vadd.f32 %v1645_v48, %v1563_v63  ;;  %v2009_v47 = vld [vmem:[%s4359_s12 + $0x28] sm:$0xff]  ;;  %v1944_v48 = vld [vmem:[%s4358_s11 + $0x20] sm:$0xff] }
 0x2de   : > { %1975 = vmatpush.msra.mxu0 %v1944_v48  ;;  %v2005_v55 = vld [vmem:[%s4359_s12 + $0x8] sm:$0xff]  ;;  %v2702_v48 = vld [vmem:[%s4360_s13 + $0x110] sm:$0xff] }
 0x2df   : > { %v1738_v5 = vadd.f32 %v1709_v53, %v1651_v60  ;;  %v1712_v6 = vpop.f32.mrf.mxu3  ;;  %v1735_v7 = vpop.f32.mrf.mxu2  ;;  %v1739_v16 = vadd.f32 %v1732_v54, %v1652_v4  ;;  %v2006_v53 = vld [vmem:[%s4359_s12 + $0x10] sm:$0xff]  ;;  %v1941_v54 = vld [vmem:[%s4358_s11 + $0x8] sm:$0xff]  ;;  %v1959_v60 = vld [vmem:[%s4358_s11 + $0x98] sm:$0xff] }
 0x2e0   : > { %1976 = vmatpush.msra.mxu0 %v1943_v50  ;;  %v1957_v63 = vld [vmem:[%s4358_s11 + $0x88] sm:$0xff]  ;;  %v2073_v4 = vld [vmem:[%s4360_s13 + $0x40] sm:$0xff] }
 0x2e1   : > { %v2687_v50 = vld [vmem:[%s4360_s13 + $0xa0] sm:$0xff] }
 0x2e4   : > { %v1625_v51 = vpop.f32.mrf.mxu0  ;;  %v1648_v52 = vpop.f32.mrf.mxu1 }
 0x2e5   : > { %v1653_v0 = vadd.f32 %v1625_v51, %v1543_v58  ;;  %v1654_v1 = vadd.f32 %v1648_v52, %v1566_v59  ;;  %v2007_v51 = vld [vmem:[%s4359_s12 + $0x18] sm:$0xff]  ;;  %v1942_v52 = vld [vmem:[%s4358_s11 + $0x10] sm:$0xff] }
 0x2e6   : > { %1977 = vmatpush.msra.mxu0 %v1942_v52  ;;  %v2023_v58 = vld [vmem:[%s4359_s12 + $0x98] sm:$0xff]  ;;  %v2022_v59 = vld [vmem:[%s4359_s12 + $0x90] sm:$0xff] }
 0x2e7   : > { %v1740_v11 = vadd.f32 %v1712_v6, %v1653_v0  ;;  %v1741_v12 = vadd.f32 %v1735_v7, %v1654_v1  ;;  %v2020_v0 = vld [vmem:[%s4359_s12 + $0x80] sm:$0xff]  ;;  %v2072_v6 = vld [vmem:[%s4360_s13 + $0x38] sm:$0xff]  ;;  %v2682_v7 = vld [vmem:[%s4360_s13 + $0x88] sm:$0xff] }
 0x2e8   : > { %1978 = vmatpush.msra.mxu0 %v1941_v54  ;;  %v1956_v1 = vld [vmem:[%s4358_s11 + $0x80] sm:$0xff]  ;;  %v2711_v52 = vld [vmem:[%s4360_s13 + $0x150] sm:$0xff]  ;;  %v2710_v54 = vld [vmem:[%s4360_s13 + $0x148] sm:$0xff] }
 0x2ec   : > { %v1795_v56 = vpop.f32.mrf.mxu0  ;;  %v1818_v57 = vpop.f32.mrf.mxu1 }
 0x2ed   : > { %v1824_v9 = vadd.f32 %v1795_v56, %v1738_v5  ;;  %v1825_v21 = vadd.f32 %v1818_v57, %v1739_v16  ;;  %v1940_v56 = vld [vmem:[%s4358_s11] sm:$0xff]  ;;  %v2683_v5 = vld [vmem:[%s4360_s13 + $0x90] sm:$0xff] }
 0x2ee   : > { %v2004_v57 = vld [vmem:[%s4359_s12] sm:$0xff]  ;;  %1979 = vmatpush.msra.mxu0 %v1940_v56  ;;  %2098 = vmatpush.msra.mxu1 %v2683_v5  ;;  %v2067_v16 = vld [vmem:[%s4360_s13 + $0x10] sm:$0xff] }
 0x2ef   : > { %v1834_v20 = vadd.f32 %v1830_v10, %v1824_v9  ;;  %v1835_v28 = vadd.f32 %v1831_v22, %v1825_v21  ;;  %v2681_v9 = vld [vmem:[%s4360_s13 + $0x80] sm:$0xff]  ;;  %v2066_v21 = vld [vmem:[%s4360_s13 + $0x8] sm:$0xff] }
 0x2f0   : > { %1996 = vmatpush.msrb.mxu0 %v1959_v60  ;;  %2099 = vmatpush.msra.mxu1 %v2682_v7  ;;  %v2709_v56 = vld [vmem:[%s4360_s13 + $0x140] sm:$0xff] }
 0x2f1   : > { %v1838_v27 = vmax.f32 %v1834_v20, 0.0  ;;  %v1839_v34 = vmax.f32 %v1835_v28, 0.0  ;;  %v2695_v28 = vld [vmem:[%s4360_s13 + $0xe0] sm:$0xff] }
 0x2f2   : > { %1997 = vmatpush.msrb.mxu0 %v1958_v61  ;;  %2100 = vmatpush.msra.mxu1 %v2681_v9  ;;  %v2253_v60 = vld [vmem:[%s4362_s15 + $0x60] sm:$0xff]  ;;  %v2252_v61 = vld [vmem:[%s4362_s15 + $0x58] sm:$0xff] }
 0x2f4   : > { %v1798_v13 = vpop.f32.mrf.mxu0  ;;  %v1821_v14 = vpop.f32.mrf.mxu1  ;;  %1998 = vmatpush.msrb.mxu0 %v1957_v63 }
 0x2f5   : > { %v1826_v17 = vadd.f32 %v1798_v13, %v1740_v11  ;;  %v1827_v18 = vadd.f32 %v1821_v14, %v1741_v12  ;;  %v2680_v11 = vld [vmem:[%s4360_s13 + $0x78] sm:$0xff]  ;;  %v2069_v12 = vld [vmem:[%s4360_s13 + $0x20] sm:$0xff]  ;;  %v2679_v13 = vld [vmem:[%s4360_s13 + $0x70] sm:$0xff] }
 0x2f6   : > { %1999 = vmatpush.msrb.mxu0 %v1956_v1  ;;  %2101 = vmatpush.msra.mxu1 %v2680_v11  ;;  %v2068_v14 = vld [vmem:[%s4360_s13 + $0x18] sm:$0xff]  ;;  %v2249_v11 = vld [vmem:[%s4362_s15 + $0x40] sm:$0xff] }
 0x2f7   : > { %v1836_v23 = vadd.f32 %v1830_v10, %v1826_v17  ;;  %v1837_v25 = vadd.f32 %v1831_v22, %v1827_v18  ;;  %v2070_v10 = vld [vmem:[%s4360_s13 + $0x28] sm:$0xff]  ;;  %v2677_v17 = vld [vmem:[%s4360_s13 + $0x60] sm:$0xff] }
 0x2f8   : > { %2102 = vmatpush.msra.mxu1 %v2679_v13  ;;  %v2696_v22 = vld [vmem:[%s4360_s13 + $0xe8] sm:$0xff]  ;;  %v2247_v13 = vld [vmem:[%s4362_s15 + $0x30] sm:$0xff] }
 0x2f9   : > { %v1840_v24 = vmax.f32 %v1836_v23, 0.0  ;;  %v1841_v32 = vmax.f32 %v1837_v25, 0.0 }
 0x2fa   : > { %2103 = vmatpush.msra.mxu1 %v2678_v15  ;;  %v2245_v15 = vld [vmem:[%s4362_s15 + $0x20] sm:$0xff] }
 0x2fb   : > { %2665 = vmatpush.msk.msrb.mxu3 %vm1847_vm8, %v1840_v24  ;;  %2669 = vmatpush.msk.msrb.mxu2 %vm1847_vm8, %v1840_v24 }
 0x2fc   : > { %2104 = vmatpush.msra.mxu1 %v2677_v17  ;;  %v2243_v17 = vld [vmem:[%s4362_s15 + $0x10] sm:$0xff] }
 0x2fd   : > { %1869 = vmatpush.msrb.mxu3 %v1838_v27  ;;  %1913 = vmatpush.msrb.mxu2 %v1838_v27  ;;  %v2065_v27 = vld [vmem:[%s4360_s13] sm:$0xff] }
 0x2fe   : > { %2666 = vmatmul.msk.f32.vlgmr.msrb.gmra.mxu3 %vm1843_vm9, %v1842_v29  ;;  %2670 = vmatmul.msk.f32.vlgmr.msrb.gmra.mxu2 %vm1843_vm9, %v1894_v30 }
 0x2ff   : > { %2667 = vmatpush.msk.msra.mxu3 %vm1847_vm8, %v1841_v32  ;;  %2024 = vmatpush.msra.mxu2 %v2019_v31  ;;  %v2694_v31 = vld [vmem:[%s4360_s13 + $0xd8] sm:$0xff] }
 0x300   : > { %2105 = vmatpush.msra.mxu1 %v2676_v26  ;;  %v2286_v26 = vld [vmem:[%s4364_s17 + $0x20] sm:$0xff] }
 0x301   : > { %1889 = vmatpush.msra.mxu3 %v1839_v34  ;;  %2025 = vmatpush.msra.mxu2 %v2018_v33  ;;  %v2717_v33 = vld [vmem:[%s4360_s13 + $0x180] sm:$0xff] }
 0x303   : > { %2671 = vmatpush.msk.msrb.mxu3 %vm1847_vm8, %v1841_v32  ;;  %2026 = vmatpush.msra.mxu2 %v2017_v35  ;;  %v2707_v32 = vld [vmem:[%s4360_s13 + $0x138] sm:$0xff]  ;;  %v2706_v35 = vld [vmem:[%s4360_s13 + $0x130] sm:$0xff] }
 0x305   : > { %1933 = vmatpush.msrb.mxu3 %v1839_v34  ;;  %2027 = vmatpush.msra.mxu2 %v2016_v36  ;;  %v2693_v34 = vld [vmem:[%s4360_s13 + $0xd0] sm:$0xff]  ;;  %v2716_v36 = vld [vmem:[%s4360_s13 + $0x178] sm:$0xff] }
 0x306   : > { %2668 = vmatmul.msk.f32.vlgmr.msra.gmra.mxu3 %vm1843_vm9, %v1842_v29  ;;  %v2718_v29 = vld [vmem:[%s4360_s13 + $0x188] sm:$0xff] }
 0x307   : > { %2028 = vmatpush.msra.mxu2 %v2015_v37  ;;  %2056 = vmatpush.msra.mxu3 %v2023_v58  ;;  %v2692_v37 = vld [vmem:[%s4360_s13 + $0xc8] sm:$0xff]  ;;  %v2255_v58 = vld [vmem:[%s4362_s15 + $0x70] sm:$0xff] }
 0x309   : > { %2029 = vmatpush.msra.mxu2 %v2014_v38  ;;  %2057 = vmatpush.msra.mxu3 %v2022_v59  ;;  %v2691_v38 = vld [vmem:[%s4360_s13 + $0xc0] sm:$0xff]  ;;  %v2254_v59 = vld [vmem:[%s4362_s15 + $0x68] sm:$0xff] }
 0x30b   : > { %2030 = vmatpush.msra.mxu2 %v2013_v39  ;;  %2058 = vmatpush.msra.mxu3 %v2021_v62  ;;  %v2705_v39 = vld [vmem:[%s4360_s13 + $0x128] sm:$0xff]  ;;  %v2251_v62 = vld [vmem:[%s4362_s15 + $0x50] sm:$0xff] }
 0x30d   : > { %2031 = vmatpush.msra.mxu2 %v2012_v41  ;;  %2059 = vmatpush.msra.mxu3 %v2020_v0  ;;  %v2690_v41 = vld [vmem:[%s4360_s13 + $0xb8] sm:$0xff] }
 0x30e   : > { %2672 = vmatmul.msk.f32.vlgmr.msrb.gmra.mxu3 %vm1843_vm9, %v1894_v30  ;;  %v2675_v30 = vld [vmem:[%s4360_s13 + $0x50] sm:$0xff] }
 0x30f   : > { %2032 = vmatpush.msra.mxu2 %v2011_v43  ;;  %2119 = vmatpush.msrb.mxu3 %v2074_v2  ;;  %v2714_v43 = vld [vmem:[%s4360_s13 + $0x168] sm:$0xff] }
 0x310   : > { %2106 = vmatpush.msra.mxu1 %v2675_v30 }
 0x311   : > { %2033 = vmatpush.msra.mxu2 %v2010_v45  ;;  %2120 = vmatpush.msrb.mxu3 %v2073_v4  ;;  %v2703_v45 = vld [vmem:[%s4360_s13 + $0x118] sm:$0xff] }
 0x312   : > { %2188 = vmatpush.msrb.mxu1 %v2707_v32 }
 0x313   : > { %2034 = vmatpush.msra.mxu2 %v2009_v47  ;;  %2121 = vmatpush.msrb.mxu3 %v2072_v6  ;;  %v2688_v47 = vld [vmem:[%s4360_s13 + $0xa8] sm:$0xff] }
 0x314   : > { %2189 = vmatpush.msrb.mxu1 %v2706_v35 }
 0x315   : > { %2035 = vmatpush.msra.mxu2 %v2008_v49  ;;  %2122 = vmatpush.msrb.mxu3 %v2071_v8  ;;  %v2712_v49 = vld [vmem:[%s4360_s13 + $0x158] sm:$0xff] }
 0x316   : > { %2190 = vmatpush.msrb.mxu1 %v2705_v39 }
 0x317   : > { %2036 = vmatpush.msra.mxu2 %v2007_v51  ;;  %2123 = vmatpush.msrb.mxu3 %v2070_v10  ;;  %v2701_v51 = vld [vmem:[%s4360_s13 + $0x108] sm:$0xff] }
 0x318   : > { %2191 = vmatpush.msrb.mxu1 %v2704_v42  ;;  %v2250_v10 = vld [vmem:[%s4362_s15 + $0x48] sm:$0xff]  ;;  %v2282_v42 = vld [vmem:[%s4364_s17] sm:$0xff] }
 0x319   : > { %2037 = vmatpush.msra.mxu2 %v2006_v53  ;;  %2124 = vmatpush.msrb.mxu3 %v2069_v12  ;;  %v2700_v53 = vld [vmem:[%s4360_s13 + $0x100] sm:$0xff]  ;;  %v2248_v12 = vld [vmem:[%s4362_s15 + $0x38] sm:$0xff] }
 0x31a   : > { %2192 = vmatpush.msrb.mxu1 %v2703_v45 }
 0x31b   : > { %2038 = vmatpush.msra.mxu2 %v2005_v55  ;;  %2125 = vmatpush.msrb.mxu3 %v2068_v14  ;;  %v2699_v55 = vld [vmem:[%s4360_s13 + $0xf8] sm:$0xff]  ;;  %v2246_v14 = vld [vmem:[%s4362_s15 + $0x28] sm:$0xff] }
 0x31c   : > { %2193 = vmatpush.msrb.mxu1 %v2702_v48 }
 0x31d   : > { %2039 = vmatpush.msra.mxu2 %v2004_v57  ;;  %2126 = vmatpush.msrb.mxu3 %v2067_v16  ;;  %v2698_v57 = vld [vmem:[%s4360_s13 + $0xf0] sm:$0xff]  ;;  %v2244_v16 = vld [vmem:[%s4362_s15 + $0x18] sm:$0xff] }
 0x31e   : > { %2194 = vmatpush.msrb.mxu1 %v2701_v51 }
 0x31f   : > { %2127 = vmatpush.msrb.mxu3 %v2066_v21  ;;  %2262 = vmatpush.msrb.mxu2 %v2255_v58  ;;  %v2291_v21 = vld [vmem:[%s4364_s17 + $0x48] sm:$0xff] }
 0x320   : > { %2195 = vmatpush.msrb.mxu1 %v2700_v53 }
 0x321   : > { %2128 = vmatpush.msrb.mxu3 %v2065_v27  ;;  %2263 = vmatpush.msrb.mxu2 %v2254_v59  ;;  %v2285_v27 = vld [vmem:[%s4364_s17 + $0x18] sm:$0xff] }
 0x322   : > { %2196 = vmatpush.msrb.mxu1 %v2699_v55 }
 0x323   : > { %2264 = vmatpush.msrb.mxu2 %v2253_v60 }
 0x324   : > { %2197 = vmatpush.msrb.mxu1 %v2698_v57 }
 0x325   : > { %2265 = vmatpush.msrb.mxu2 %v2252_v61 }
 0x327   : > { %2266 = vmatpush.msrb.mxu2 %v2251_v62 }
 0x329   : > { %2267 = vmatpush.msrb.mxu2 %v2250_v10 }
 0x32b   : > { %2268 = vmatpush.msrb.mxu2 %v2249_v11 }
 0x32d   : > { %2269 = vmatpush.msrb.mxu2 %v2248_v12 }
 0x32f   : > { %2270 = vmatpush.msrb.mxu2 %v2247_v13 }
 0x331   : > { %2271 = vmatpush.msrb.mxu2 %v2246_v14 }
 0x333   : > { %2272 = vmatpush.msrb.mxu2 %v2245_v15 }
 0x335   : > { %2273 = vmatpush.msrb.mxu2 %v2244_v16 }
 0x337   : > { %2274 = vmatpush.msrb.mxu2 %v2243_v17 }
 0x381   : > { %v1871_v18 = vpop.f32.mrf.mxu3  ;;  %v1915_v19 = vpop.f32.mrf.mxu2 }
 0x382   : > { %v1938_v20 = vmax.f32 %v1871_v18, %v1915_v19  ;;  %v2242_v18 = vld [vmem:[%s4362_s15 + $0x8] sm:$0xff]  ;;  %v2241_v19 = vld [vmem:[%s4362_s15] sm:$0xff] }
 0x383   : > { %2275 = vmatpush.msrb.mxu2 %v2242_v18 }
 0x384   : > { %1980 = vmatmul.f32.vlgmr.msra.gmra.mxu0 %v1938_v20  ;;  %2040 = vmatmul.f32.vlgmr.msra.gmra.mxu2 %v1938_v20  ;;  %v2292_v20 = vld [vmem:[%s4364_s17 + $0x50] sm:$0xf] }
 0x385   : > { %2153 = vmatpush.msra.mxu0 %v2696_v22  ;;  %2276 = vmatpush.msrb.mxu2 %v2241_v19  ;;  %v2290_v22 = vld [vmem:[%s4364_s17 + $0x40] sm:$0xff] }
 0x387   : > { %2154 = vmatpush.msra.mxu0 %v2695_v28 }
 0x389   : > { %v1891_v23 = vpop.f32.mrf.mxu3  ;;  %2155 = vmatpush.msra.mxu0 %v2694_v31 }
 0x38b   : > { %2156 = vmatpush.msra.mxu0 %v2693_v34 }
 0x38d   : > { %2157 = vmatpush.msra.mxu0 %v2692_v37 }
 0x38f   : > { %2158 = vmatpush.msra.mxu0 %v2691_v38 }
 0x391   : > { %v1935_v24 = vpop.f32.mrf.mxu3  ;;  %2159 = vmatpush.msra.mxu0 %v2690_v41  ;;  %v2283_v41 = vld [vmem:[%s4364_s17 + $0x8] sm:$0xff] }
 0x392   : > { %v1939_v25 = vmax.f32 %v1891_v23, %v1935_v24  ;;  %v2289_v23 = vld [vmem:[%s4364_s17 + $0x38] sm:$0xff]  ;;  %v2288_v24 = vld [vmem:[%s4364_s17 + $0x30] sm:$0xff] }
 0x393   : > { %2160 = vmatpush.msra.mxu0 %v2689_v44 }
 0x394   : > { %2674 = vmatmul.msk.f32.vlgmr.msra.gmra.mxu3 %vm1960_vm10, %v1939_v25  ;;  %2673 = vmatmul.msk.f32.vlgmr.msrb.gmra.mxu0 %vm1960_vm10, %v1939_v25  ;;  %v2287_v25 = vld [vmem:[%s4364_s17 + $0x28] sm:$0xff] }
 0x395   : > { %2223 = vmatpush.msra.mxu3 %v2718_v29  ;;  %2161 = vmatpush.msra.mxu0 %v2688_v47  ;;  %v2293_v47 = vld [vmem:[%s4400_s3] sm:$0x1] }
 0x397   : > { %2224 = vmatpush.msra.mxu3 %v2717_v33  ;;  %2162 = vmatpush.msra.mxu0 %v2687_v50 }
 0x399   : > { %2225 = vmatpush.msra.mxu3 %v2716_v36  ;;  %2721 = vmatpush.msk.msrb.mxu0 %vm1150_vm1, %v2292_v20  ;;  %v2238_v36 = vld [vmem:[%s4361_s14] sm:$0x1] }
 0x39b   : > { %2226 = vmatpush.msra.mxu3 %v2715_v40  ;;  %2306 = vmatpush.msrb.mxu0 %v2291_v21  ;;  %v2284_v40 = vld [vmem:[%s4364_s17 + $0x10] sm:$0xff] }
 0x39d   : > { %2227 = vmatpush.msra.mxu3 %v2714_v43  ;;  %2307 = vmatpush.msrb.mxu0 %v2290_v22  ;;  %v2256_v43 = vld [vmem:[%s4363_s16] sm:$0x1] }
 0x39f   : > { %2228 = vmatpush.msra.mxu3 %v2713_v46  ;;  %2308 = vmatpush.msrb.mxu0 %v2289_v23 }
 0x3a1   : > { %2229 = vmatpush.msra.mxu3 %v2712_v49  ;;  %2309 = vmatpush.msrb.mxu0 %v2288_v24 }
 0x3a3   : > { %2230 = vmatpush.msra.mxu3 %v2711_v52  ;;  %2310 = vmatpush.msrb.mxu0 %v2287_v25 }
 0x3a5   : > { %2231 = vmatpush.msra.mxu3 %v2710_v54  ;;  %2311 = vmatpush.msrb.mxu0 %v2286_v26 }
 0x3a7   : > { %2232 = vmatpush.msra.mxu3 %v2709_v56  ;;  %2312 = vmatpush.msrb.mxu0 %v2285_v27 }
 0x3a9   : > { %2313 = vmatpush.msrb.mxu0 %v2284_v40 }
 0x3ab   : > { %2314 = vmatpush.msrb.mxu0 %v2283_v41 }
 0x3ad   : > { %2315 = vmatpush.msrb.mxu0 %v2282_v42 }
 0x401   : > { %v1981_v63 = vpop.f32.mrf.mxu0 }
 0x407   : > { %v2041_v1 = vpop.f32.mrf.mxu2 }
 0x411   : > { %v2001_v0 = vpop.f32.mrf.mxu0 }
 0x412   : > { %v2002_v3 = vadd.f32 %v2001_v0, %v1981_v63 }
 0x417   : > { %v2061_v2 = vpop.f32.mrf.mxu3 }
 0x418   : > { %v2062_v4 = vadd.f32 %v2061_v2, %v2041_v1 }
 0x41a   : > { %v2064_v5 = vmax.f32 %v2002_v3, %v2062_v4 }
 0x41c   : > { %2686 = vmatmul.msk.f32.vlgmr.msrb.gmra.mxu3 %vm2088_vm11, %v2064_v5  ;;  %v2087_v6 = vrot.slane %v2064_v5, 1  ;;  %v2144_v7 = vrot.slane %v2064_v5, 2  ;;  %v2214_v8 = vrot.slane %v2064_v5, 4  ;;  %v2179_v9 = vrot.slane %v2064_v5, 3 }
 0x41e   : > { %2685 = vmatmul.msk.f32.vlgmr.msra.gmra.mxu1 %vm2088_vm11, %v2087_v6  ;;  %2697 = vmatmul.msk.f32.vlgmr.msra.gmra.mxu0 %vm2088_vm11, %v2144_v7 }
 0x424   : > { %2719 = vmatmul.msk.f32.vlgmr.msra.gmra.mxu3 %vm2088_vm11, %v2214_v8 }
 0x426   : > { %2708 = vmatmul.msk.f32.vlgmr.msrb.gmra.mxu1 %vm2088_vm11, %v2179_v9 }
 0x49b   : > { %v2108_v28 = vpop.f32.mrf.mxu1  ;;  %v2164_v31 = vpop.f32.mrf.mxu0 }
 0x49f   : > { %v2130_v29 = vpop.f32.mrf.mxu3 }
 0x4a0   : > { %v2131_v30 = vadd.f32 %v2130_v29, %v2108_v28 }
 0x4a2   : > { %v2167_v32 = vadd.f32 %v2164_v31, %v2131_v30 }
 0x4a3   : > { %v2199_v33 = vpop.f32.mrf.mxu1 }
 0x4a4   : > { %v2202_v34 = vadd.f32 %v2199_v33, %v2167_v32 }
 0x4a7   : > { %v2234_v35 = vpop.f32.mrf.mxu3 }
 0x4a8   : > { %v2237_v37 = vadd.f32 %v2234_v35, %v2202_v34 }
 0x4aa   : > { %v2239_v38 = vadd.f32 %v2238_v36, %v2237_v37 }
 0x4ac   : > { %v2240_v39 = vmax.f32 %v2239_v38, 0.0 }
 0x4ae   : > { %2720 = vmatmul.msk.f32.vlgmr.msrb.gmra.mxu2 %vm2257_vm12, %v2240_v39 }
 0x531   : > { %v2278_v44 = vpop.f32.mrf.mxu2 }
 0x532   : > { %v2279_v45 = vadd.f32 %v2278_v44, %v2256_v43 }
 0x534   : > { %v2281_v46 = vmax.f32 %v2279_v45, 0.0 }
 0x536   : > { %2722 = vmatmul.msk.f32.vlgmr.msrb.gmra.mxu0 %vm1455_vm4, %v2281_v46 }
 0x5b3   : > { %v2317_v48 = vpop.f32.mrf.mxu0 }
 0x5b4   : > { %v2318_v49 = vadd.f32 %v2317_v48, %v2293_v47 }
 0x5b6   : > { %2320 = vst [vmem:[%s594_s0] sm:$0x1] %v2318_v49 }
 0x5b7   : > { %2792 = shalt.err (!%p2789_p3)
}
 0x5b8   : > { %2726 = dma.vmem_to_hbm [thread:$0]  (%p2967_p5), %s2333_s21, 16, %s2335_s4, %s2322_s26  }
 0x5b9 PF: > { %s4401_s24 = sld [smem:[#allocation7_spill]] }
 0x5ba   : > { %s4402_s27 = sld [smem:[#allocation5_spill]] }
 0x5bf   : > { %p2732_p4 = scmp.ge.s32.totalorder %s4401_s24, 2 }
 0x5c0   : > { %s2346_s0 = sand.u32 1, %s4402_s27  }
 0x5c1   : > { %p2729_p7 = pnand %p2732_p4, %p2971_p6  ;;  %s2347_s1 = scalar_lea.sflag [#allocation3], %s2346_s0 }
 0x5c3   : > { %p2730_p8 = pneg %p2729_p7 }
 0x5c5   : > { %2810 = dma.done.wait (%p2730_p8), %s2347_s1, 16  }
 0x5c6   : > { %2812 = vsyncadd (%p2730_p8), %s2347_s1, 4294967280  ;;  %s4404_s21 = sld [smem:[#allocation8_spill]]  ;;  %s4407_s0 = smov %s2819_s30 }
 0x5c7   : > { %s4405_s5 = sld [smem:[#allocation6_spill]] }
 0x5c8   : > { %s4406_s20 = sld [smem:[#allocation9_spill]] }
 0x5cc   : > { %p29_p9 = scmp.ge.s32.totalorder %s4404_s21, 4  }
 0x5cd   : > { %s4408_s30 = smov %s4405_s5 }
 0x5ce   :  { %31 = sbr.rel (!%p29_p9) target bundleno = 11 (0xb), region = 143 }
 0x5d3   :  { %2352 = vsyncpa [#allocation3], 1 }
 0x5d4   :  { %2354 = vsyncpa [#allocation3 + $0x1], 1 }

</bundles_post_ra>
